<compile_context>
chip_gen: v7x
topology: tpu7x:2x2x1
jax: 0.10.0
libtpu: 0.0.40
codegen_flags: <defaults>
</compile_context>

<pallas_src>
import functools

import jax
import jax.numpy as jnp
from jax import lax
from jax.experimental import pallas as pl
from jax.experimental.pallas import tpu as pltpu

IN_CHANNELS = 4
FEAT_CHANNELS = [32, 64]
VOXEL_SIZE = (0.2, 0.2, 4.0)
PC_RANGE = (0.0, -40.0, -3.0, 70.4, 40.0, 1.0)
BN_EPS = 1e-3

VX, VY, VZ = VOXEL_SIZE
X_OFF = VX / 2 + PC_RANGE[0]
Y_OFF = VY / 2 + PC_RANGE[1]
Z_OFF = VZ / 2 + PC_RANGE[2]

C_AUG = IN_CHANNELS + 3 + 3          # +cluster-center +voxel-center -> 10
C0 = FEAT_CHANNELS[0]                # 32
C1 = FEAT_CHANNELS[1]                # 64 (layer-1 input is 2*C0 = 64)

META_ROWS = 8                        # [npts, 1/npts, off_x, off_y, off_z, 0, 0, 0]


def _round_up(x, m):
    return (x + m - 1) // m * m


def hardvfe_kernel(feat_ref, meta_ref,
                   w0e_ref, wm_ref, wc_ref, b0_ref,
                   w1a_ref, w1b_ref, b1_ref,
                   out_ref, *, tm, n):
    f32 = jnp.float32
    feat = feat_ref[...]                         # (4, n*tm): lane l = p*tm + m_local
    meta = meta_ref[...]                         # (8, tm)
    npts = meta[0:1, :]                          # (1, tm)
    inv_npts = meta[1:2, :]                      # (1, tm)

    # ---- per-voxel bias from the folded cluster-center / voxel-center terms.
    # Sums all N slots (zero-padded by hard voxelization), exactly like the ref.
    fsum = feat[:, 0:tm]
    for p in range(1, n):
        fsum = fsum + feat[:, p * tm:(p + 1) * tm]              # (4, tm)
    mean_scaled = fsum * inv_npts                               # (4, tm)
    vox_bias = (jnp.dot(wm_ref[...], mean_scaled, preferred_element_type=f32) +
                jnp.dot(wc_ref[...], meta, preferred_element_type=f32))      # (C0, tm)

    # ---- VFE layer 0: Linear(10->32, folded to 4->32 + per-voxel bias), BN
    #      folded, ReLU, max over points.  Mask applied after the matmul
    #      (row-masking commutes with the linear); padded slots end up relu(b0)
    #      exactly as in mmdet3d.
    x0 = jnp.dot(w0e_ref[...], feat, preferred_element_type=f32)             # (C0, n*tm)
    b0 = b0_ref[...]                                                         # (C0, 1)
    agg0 = None
    pw0_chunks = []
    for p in range(n):
        xp = x0[:, p * tm:(p + 1) * tm] + vox_bias                           # (C0, tm)
        valid = npts > float(p)                                              # (1, tm)
        pw = jnp.maximum(jnp.where(valid, xp, 0.0) + b0, 0.0)                # (C0, tm)
        pw0_chunks.append(pw)
        agg0 = pw if agg0 is None else jnp.maximum(agg0, pw)                 # running max

    # ---- VFE layer 1: Linear(64->64, BN folded) split into a per-point half
    #      (W1a) and a per-voxel pooled half (W1b).  Since y_vox is constant
    #      over points and ReLU is monotone:
    #         max_p relu(y_pt[p] + y_vox) == relu(max_p y_pt[p] + y_vox)
    y_vox = jnp.dot(w1b_ref[...], agg0, preferred_element_type=f32) + b1_ref[...]  # (C1, tm)
    w1a = w1a_ref[...]                                                       # (C1, C0)
    y_max = None
    for p in range(n):
        yp = jnp.dot(w1a, pw0_chunks[p], preferred_element_type=f32)         # (C1, tm)
        y_max = yp if y_max is None else jnp.maximum(y_max, yp)
    out_ref[...] = jnp.maximum(y_max + y_vox, 0.0)                           # (C1, tm)


def hardvfe_pallas(features, num_points, coors, params, *, tm=512):
    """Fused HardVFE forward.  features: (M, N, 4), num_points: (M,), coors: (M, 4)."""
    M, N, C = features.shape
    assert C == IN_CHANNELS
    w0, s0, b0, w1, s1, b1 = params

    # ---- host-side weight prep: fold BN scale + feature augmentation, transpose.
    w0s = (w0 * s0).astype(jnp.float32)                         # (10, C0)
    w1s = (w1 * s1).astype(jnp.float32)                         # (2*C0, C1)
    w0e_t = jnp.concatenate(
        [w0s[0:3] + w0s[4:7] + w0s[7:10], w0s[3:4]], axis=0).T  # (C0, 4)
    wm_t = jnp.concatenate(
        [-w0s[4:7], jnp.zeros((1, C0), jnp.float32)], axis=0).T  # (C0, 4)  cluster term
    wc_t = jnp.zeros((C0, META_ROWS), jnp.float32)
    wc_t = wc_t.at[:, 2:5].set(-w0s[7:10].T)                     # (C0, 8)  center term
    w1a_t = w1s[:C0].T                                           # (C1, C0)
    w1b_t = w1s[C0:].T                                           # (C1, C0)
    b0_c = b0.reshape(C0, 1)
    b1_c = b1.reshape(C1, 1)

    # ---- per-voxel metadata (transposed): num_points, guarded reciprocal, offsets.
    npts_f = num_points.astype(jnp.float32)
    inv_npts = 1.0 / jnp.maximum(npts_f, 1.0)       # deliberate deviation for npts==0
    coors_f = coors.astype(jnp.float32)
    offs = jnp.stack([coors_f[:, 3] * VX + X_OFF,
                      coors_f[:, 2] * VY + Y_OFF,
                      coors_f[:, 1] * VZ + Z_OFF], axis=-1)      # (M, 3)
    meta = jnp.zeros((M, META_ROWS), jnp.float32)
    meta = meta.at[:, 0].set(npts_f).at[:, 1].set(inv_npts).at[:, 2:5].set(offs)

    # ---- tile size: multiple of 128 (lane-dense), >=2 grid steps when possible.
    m_ceil = _round_up(M, 128)
    tm_eff = max(128, min(_round_up(max(tm, 1), 128), m_ceil))
    if m_ceil // tm_eff < 2 and m_ceil >= 256:
        tm_eff = _round_up((m_ceil + 1) // 2, 128)
    n_tiles = -(-m_ceil // tm_eff)
    M_pad = n_tiles * tm_eff

    feat = features.astype(jnp.float32)
    if M_pad != M:
        feat = jnp.pad(feat, ((0, M_pad - M), (0, 0), (0, 0)))
        meta = jnp.pad(meta, ((0, M_pad - M), (0, 0)))   # padded voxels: npts=0, inv=0

    # Layout plumbing (host side): channels -> sublanes, per-tile lane order
    # l = point*tm + local_voxel so per-voxel broadcasts are whole-vreg cheap.
    feat_t = (feat.reshape(n_tiles, tm_eff, N, C)
                  .transpose(3, 0, 2, 1)
                  .reshape(C, n_tiles * N * tm_eff))             # (4, n_tiles*N*tm)
    meta_t = meta.T                                              # (8, M_pad)

    kernel = functools.partial(hardvfe_kernel, tm=tm_eff, n=N)
    out_t = pl.pallas_call(
        kernel,
        out_shape=jax.ShapeDtypeStruct((C1, M_pad), jnp.float32),
        grid_spec=pltpu.PrefetchScalarGridSpec(
            num_scalar_prefetch=0,
            grid=(n_tiles,),
            in_specs=[
                pl.BlockSpec((IN_CHANNELS, N * tm_eff), lambda i: (0, i)),  # features^T
                pl.BlockSpec((META_ROWS, tm_eff), lambda i: (0, i)),        # meta^T
                pl.BlockSpec((C0, IN_CHANNELS), lambda i: (0, 0)),          # W0_eff^T
                pl.BlockSpec((C0, IN_CHANNELS), lambda i: (0, 0)),          # W_mean^T
                pl.BlockSpec((C0, META_ROWS), lambda i: (0, 0)),            # W_center^T
                pl.BlockSpec((C0, 1), lambda i: (0, 0)),                    # b0 (BN shift)
                pl.BlockSpec((C1, C0), lambda i: (0, 0)),                   # W1a^T
                pl.BlockSpec((C1, C0), lambda i: (0, 0)),                   # W1b^T
                pl.BlockSpec((C1, 1), lambda i: (0, 0)),                    # b1 (BN shift)
            ],
            out_specs=pl.BlockSpec((C1, tm_eff), lambda i: (0, i)),
        ),
        compiler_params=pltpu.CompilerParams(
            dimension_semantics=("parallel",),
            vmem_limit_bytes=32 * 1024 * 1024),
    )(feat_t, meta_t, w0e_t, wm_t, wc_t, b0_c, w1a_t, w1b_t, b1_c)

    return out_t.T[:M]            # back to the module's (M, C1) layout


def hardvfe_ref(features, num_points, coors, params):
    """Pure-JAX reference of the same forward pass (unfused, spec layout)."""
    w0, s0, b0, w1, s1, b1 = params
    feat = features.astype(jnp.float32)
    M, N, _ = feat.shape
    npts = num_points.astype(jnp.float32).reshape(M, 1, 1)
    coors_f = coors.astype(jnp.float32)
    xyz = feat[:, :, :3]
    f_cluster = xyz - xyz.sum(axis=1, keepdims=True) / npts
    offsets = jnp.stack([coors_f[:, 3] * VX + X_OFF,
                         coors_f[:, 2] * VY + Y_OFF,
                         coors_f[:, 1] * VZ + Z_OFF], axis=-1)[:, None, :]
    f_center = xyz - offsets
    vf = jnp.concatenate([feat, f_cluster, f_center], axis=-1)
    mask = (jnp.arange(N)[None, :] < num_points[:, None]).astype(jnp.float32)
    vf = vf * mask[:, :, None]
    hp = lax.Precision.HIGHEST
    x = jnp.maximum(jnp.dot(vf, w0, precision=hp) * s0 + b0, 0.0)
    agg = jnp.max(x, axis=1, keepdims=True)
    cat = jnp.concatenate([x, jnp.broadcast_to(agg, x.shape)], axis=-1)
    y = jnp.maximum(jnp.dot(cat, w1, precision=hp) * s1 + b1, 0.0)
    return jnp.max(y, axis=1)


def init_params(key):
    ks = jax.random.split(key, 8)

    def bn_fold(kg, kb, c):
        gamma = 1.0 + 0.1 * jax.random.normal(kg, (c,), jnp.float32)
        beta = 0.1 * jax.random.normal(kb, (c,), jnp.float32)
        mean = 0.05 * jax.random.normal(jax.random.fold_in(kg, 1), (c,), jnp.float32)
        var = 1.0 + 0.1 * jax.random.uniform(jax.random.fold_in(kb, 1), (c,), jnp.float32)
        scale = gamma / jnp.sqrt(var + BN_EPS)
        shift = beta - mean * scale
        return scale.reshape(1, c), shift.reshape(1, c)

    w0 = 0.1 * jax.random.normal(ks[0], (C_AUG, C0), jnp.float32)
    s0, b0 = bn_fold(ks[1], ks[2], C0)
    w1 = 0.1 * jax.random.normal(ks[3], (2 * C0, C1), jnp.float32)
    s1, b1 = bn_fold(ks[4], ks[5], C1)
    return w0, s0, b0, w1, s1, b1


if __name__ == "__main__":
    key = jax.random.PRNGKey(0)
    kf, kn, kb, kz, ky, kx, kp = jax.random.split(key, 7)

    M, N = 200, 16   # small test; exercises padding (200 -> 256) and a 2-step grid
    unit = jax.random.uniform(kf, (M, N, IN_CHANNELS), jnp.float32)
    lo = jnp.array([PC_RANGE[0], PC_RANGE[1], PC_RANGE[2], 0.0], jnp.float32)
    hi = jnp.array([PC_RANGE[3], PC_RANGE[4], PC_RANGE[5], 1.0], jnp.float32)
    features = lo + unit * (hi - lo)            # realistic coordinate magnitudes
    num_points = jax.random.randint(kn, (M,), 1, N + 1, jnp.int32)
    # hard voxelization zero-pads unused point slots
    valid = (jnp.arange(N)[None, :] < num_points[:, None]).astype(jnp.float32)
    features = features * valid[:, :, None]
    coors = jnp.concatenate([
        jax.random.randint(kb, (M, 1), 0, 2, jnp.int32),     # batch idx
        jax.random.randint(kz, (M, 1), 0, 1, jnp.int32),     # z
        jax.random.randint(ky, (M, 1), 0, 400, jnp.int32),   # y
        jax.random.randint(kx, (M, 1), 0, 352, jnp.int32),   # x
    ], axis=1)

    params = init_params(kp)

    out = jax.block_until_ready(
        hardvfe_pallas(features, num_points, coors, params, tm=128))
    ref = jax.block_until_ready(hardvfe_ref(features, num_points, coors, params))

    assert out.shape == (M, C1)
    assert bool(jnp.all(jnp.isfinite(out)))
    assert jnp.allclose(out, ref, rtol=1e-2, atol=1e-2), "mismatch vs reference"

    # TODO(synk): fusion_layer / fusion_with_mask (image-feature fusion over
    # ragged per-point sets) is not translated; fusion_layer=None path only.
    print("KERNEL_OK")
</pallas_src>

<mosaic_0001>
module attributes {stable_mosaic.version = 11 : i64} {
  func.func @hardvfe_kernel(%arg0: i32, %arg1: memref<4x2048xf32, #tpu.memory_space<vmem>>, %arg2: memref<8x128xf32, #tpu.memory_space<vmem>>, %arg3: memref<32x4xf32, #tpu.memory_space<vmem>>, %arg4: memref<32x4xf32, #tpu.memory_space<vmem>>, %arg5: memref<32x8xf32, #tpu.memory_space<vmem>>, %arg6: memref<32x1xf32, #tpu.memory_space<vmem>>, %arg7: memref<64x32xf32, #tpu.memory_space<vmem>>, %arg8: memref<64x32xf32, #tpu.memory_space<vmem>>, %arg9: memref<64x1xf32, #tpu.memory_space<vmem>>, %arg10: memref<64x128xf32, #tpu.memory_space<vmem>>) attributes {dimension_semantics = [#tpu.dimension_semantics<parallel>], iteration_bounds = array<i64: 2>, scalar_prefetch = 0 : i64, scratch_operands = 0 : i64, tpu.core_type = #tpu.core_type<tc>, window_params = [{transform_indices = @transform_0, window_bounds = array<i64: 4, 2048>}, {transform_indices = @transform_1, window_bounds = array<i64: 8, 128>}, {pipeline_mode = #tpu.pipeline_mode<synchronous>, transform_indices = @transform_2, window_bounds = array<i64: 32, 4>}, {pipeline_mode = #tpu.pipeline_mode<synchronous>, transform_indices = @transform_3, window_bounds = array<i64: 32, 4>}, {pipeline_mode = #tpu.pipeline_mode<synchronous>, transform_indices = @transform_4, window_bounds = array<i64: 32, 8>}, {pipeline_mode = #tpu.pipeline_mode<synchronous>, transform_indices = @transform_5, window_bounds = array<i64: 32, 1>}, {pipeline_mode = #tpu.pipeline_mode<synchronous>, transform_indices = @transform_6, window_bounds = array<i64: 64, 32>}, {pipeline_mode = #tpu.pipeline_mode<synchronous>, transform_indices = @transform_7, window_bounds = array<i64: 64, 32>}, {pipeline_mode = #tpu.pipeline_mode<synchronous>, transform_indices = @transform_8, window_bounds = array<i64: 64, 1>}, {transform_indices = @transform_9, window_bounds = array<i64: 64, 128>}]} {
    %c0 = arith.constant 0 : index
    %c0_0 = arith.constant 0 : index
    %0 = vector.load %arg1[%c0, %c0_0] : memref<4x2048xf32, #tpu.memory_space<vmem>>, vector<4x2048xf32>
    %c0_1 = arith.constant 0 : index
    %c0_2 = arith.constant 0 : index
    %1 = vector.load %arg2[%c0_1, %c0_2] : memref<8x128xf32, #tpu.memory_space<vmem>>, vector<8x128xf32>
    %2 = vector.extract_strided_slice %1 {offsets = [0, 0], sizes = [1, 128], strides = [1, 1]} : vector<8x128xf32> to vector<1x128xf32>
    %3 = vector.extract_strided_slice %1 {offsets = [1, 0], sizes = [1, 128], strides = [1, 1]} : vector<8x128xf32> to vector<1x128xf32>
    %4 = vector.extract_strided_slice %0 {offsets = [0, 0], sizes = [4, 128], strides = [1, 1]} : vector<4x2048xf32> to vector<4x128xf32>
    %5 = vector.extract_strided_slice %0 {offsets = [0, 128], sizes = [4, 128], strides = [1, 1]} : vector<4x2048xf32> to vector<4x128xf32>
    %6 = arith.addf %4, %5 : vector<4x128xf32>
    %7 = vector.extract_strided_slice %0 {offsets = [0, 256], sizes = [4, 128], strides = [1, 1]} : vector<4x2048xf32> to vector<4x128xf32>
    %8 = arith.addf %6, %7 : vector<4x128xf32>
    %9 = vector.extract_strided_slice %0 {offsets = [0, 384], sizes = [4, 128], strides = [1, 1]} : vector<4x2048xf32> to vector<4x128xf32>
    %10 = arith.addf %8, %9 : vector<4x128xf32>
    %11 = vector.extract_strided_slice %0 {offsets = [0, 512], sizes = [4, 128], strides = [1, 1]} : vector<4x2048xf32> to vector<4x128xf32>
    %12 = arith.addf %10, %11 : vector<4x128xf32>
    %13 = vector.extract_strided_slice %0 {offsets = [0, 640], sizes = [4, 128], strides = [1, 1]} : vector<4x2048xf32> to vector<4x128xf32>
    %14 = arith.addf %12, %13 : vector<4x128xf32>
    %15 = vector.extract_strided_slice %0 {offsets = [0, 768], sizes = [4, 128], strides = [1, 1]} : vector<4x2048xf32> to vector<4x128xf32>
    %16 = arith.addf %14, %15 : vector<4x128xf32>
    %17 = vector.extract_strided_slice %0 {offsets = [0, 896], sizes = [4, 128], strides = [1, 1]} : vector<4x2048xf32> to vector<4x128xf32>
    %18 = arith.addf %16, %17 : vector<4x128xf32>
    %19 = vector.extract_strided_slice %0 {offsets = [0, 1024], sizes = [4, 128], strides = [1, 1]} : vector<4x2048xf32> to vector<4x128xf32>
    %20 = arith.addf %18, %19 : vector<4x128xf32>
    %21 = vector.extract_strided_slice %0 {offsets = [0, 1152], sizes = [4, 128], strides = [1, 1]} : vector<4x2048xf32> to vector<4x128xf32>
    %22 = arith.addf %20, %21 : vector<4x128xf32>
    %23 = vector.extract_strided_slice %0 {offsets = [0, 1280], sizes = [4, 128], strides = [1, 1]} : vector<4x2048xf32> to vector<4x128xf32>
    %24 = arith.addf %22, %23 : vector<4x128xf32>
    %25 = vector.extract_strided_slice %0 {offsets = [0, 1408], sizes = [4, 128], strides = [1, 1]} : vector<4x2048xf32> to vector<4x128xf32>
    %26 = arith.addf %24, %25 : vector<4x128xf32>
    %27 = vector.extract_strided_slice %0 {offsets = [0, 1536], sizes = [4, 128], strides = [1, 1]} : vector<4x2048xf32> to vector<4x128xf32>
    %28 = arith.addf %26, %27 : vector<4x128xf32>
    %29 = vector.extract_strided_slice %0 {offsets = [0, 1664], sizes = [4, 128], strides = [1, 1]} : vector<4x2048xf32> to vector<4x128xf32>
    %30 = arith.addf %28, %29 : vector<4x128xf32>
    %31 = vector.extract_strided_slice %0 {offsets = [0, 1792], sizes = [4, 128], strides = [1, 1]} : vector<4x2048xf32> to vector<4x128xf32>
    %32 = arith.addf %30, %31 : vector<4x128xf32>
    %33 = vector.extract_strided_slice %0 {offsets = [0, 1920], sizes = [4, 128], strides = [1, 1]} : vector<4x2048xf32> to vector<4x128xf32>
    %34 = arith.addf %32, %33 : vector<4x128xf32>
    %35 = vector.broadcast %3 : vector<1x128xf32> to vector<4x128xf32>
    %36 = arith.mulf %34, %35 : vector<4x128xf32>
    %c0_3 = arith.constant 0 : index
    %c0_4 = arith.constant 0 : index
    %37 = vector.load %arg4[%c0_3, %c0_4] : memref<32x4xf32, #tpu.memory_space<vmem>>, vector<32x4xf32>
    %cst = arith.constant dense<0.000000e+00> : vector<32x128xf32>
    %38 = tpu.matmul %37, %36, %cst {dimension_numbers = #tpu.dot_dimension_numbers<[1], [0], [0], [1], [0, 0, 1, 1], [], []>} : vector<32x4xf32>, vector<4x128xf32>, vector<32x128xf32> -> vector<32x128xf32>
    %c0_5 = arith.constant 0 : index
    %c0_6 = arith.constant 0 : index
    %39 = vector.load %arg5[%c0_5, %c0_6] : memref<32x8xf32, #tpu.memory_space<vmem>>, vector<32x8xf32>
    %cst_7 = arith.constant dense<0.000000e+00> : vector<32x128xf32>
    %40 = tpu.matmul %39, %1, %cst_7 {dimension_numbers = #tpu.dot_dimension_numbers<[1], [0], [0], [1], [0, 0, 1, 1], [], []>} : vector<32x8xf32>, vector<8x128xf32>, vector<32x128xf32> -> vector<32x128xf32>
    %41 = arith.addf %38, %40 : vector<32x128xf32>
    %c0_8 = arith.constant 0 : index
    %c0_9 = arith.constant 0 : index
    %42 = vector.load %arg3[%c0_8, %c0_9] : memref<32x4xf32, #tpu.memory_space<vmem>>, vector<32x4xf32>
    %cst_10 = arith.constant dense<0.000000e+00> : vector<32x2048xf32>
    %43 = tpu.matmul %42, %0, %cst_10 {dimension_numbers = #tpu.dot_dimension_numbers<[1], [0], [0], [1], [0, 0, 1, 1], [], []>} : vector<32x4xf32>, vector<4x2048xf32>, vector<32x2048xf32> -> vector<32x2048xf32>
    %c0_11 = arith.constant 0 : index
    %c0_12 = arith.constant 0 : index
    %44 = vector.load %arg6[%c0_11, %c0_12] : memref<32x1xf32, #tpu.memory_space<vmem>>, vector<32x1xf32>
    %45 = vector.extract_strided_slice %43 {offsets = [0, 0], sizes = [32, 128], strides = [1, 1]} : vector<32x2048xf32> to vector<32x128xf32>
    %46 = arith.addf %45, %41 : vector<32x128xf32>
    %cst_13 = arith.constant 0.000000e+00 : f32
    %47 = vector.broadcast %cst_13 : f32 to vector<1x128xf32>
    %48 = arith.cmpf ogt, %2, %47 : vector<1x128xf32>
    %cst_14 = arith.constant 0.000000e+00 : f32
    %49 = vector.shape_cast %48 : vector<1x128xi1> to vector<1x128xi1>
    %50 = vector.broadcast %49 : vector<1x128xi1> to vector<32x128xi1>
    %51 = vector.broadcast %cst_14 : f32 to vector<32x128xf32>
    %52 = arith.select %50, %46, %51 : vector<32x128xi1>, vector<32x128xf32>
    %53 = vector.broadcast %44 : vector<32x1xf32> to vector<32x128xf32>
    %54 = arith.addf %52, %53 : vector<32x128xf32>
    %cst_15 = arith.constant 0.000000e+00 : f32
    %55 = vector.broadcast %cst_15 : f32 to vector<32x128xf32>
    %56 = arith.maximumf %54, %55 : vector<32x128xf32>
    %57 = vector.extract_strided_slice %43 {offsets = [0, 128], sizes = [32, 128], strides = [1, 1]} : vector<32x2048xf32> to vector<32x128xf32>
    %58 = arith.addf %57, %41 : vector<32x128xf32>
    %cst_16 = arith.constant 1.000000e+00 : f32
    %59 = vector.broadcast %cst_16 : f32 to vector<1x128xf32>
    %60 = arith.cmpf ogt, %2, %59 : vector<1x128xf32>
    %cst_17 = arith.constant 0.000000e+00 : f32
    %61 = vector.shape_cast %60 : vector<1x128xi1> to vector<1x128xi1>
    %62 = vector.broadcast %61 : vector<1x128xi1> to vector<32x128xi1>
    %63 = vector.broadcast %cst_17 : f32 to vector<32x128xf32>
    %64 = arith.select %62, %58, %63 : vector<32x128xi1>, vector<32x128xf32>
    %65 = vector.broadcast %44 : vector<32x1xf32> to vector<32x128xf32>
    %66 = arith.addf %64, %65 : vector<32x128xf32>
    %cst_18 = arith.constant 0.000000e+00 : f32
    %67 = vector.broadcast %cst_18 : f32 to vector<32x128xf32>
    %68 = arith.maximumf %66, %67 : vector<32x128xf32>
    %69 = arith.maximumf %56, %68 : vector<32x128xf32>
    %70 = vector.extract_strided_slice %43 {offsets = [0, 256], sizes = [32, 128], strides = [1, 1]} : vector<32x2048xf32> to vector<32x128xf32>
    %71 = arith.addf %70, %41 : vector<32x128xf32>
    %cst_19 = arith.constant 2.000000e+00 : f32
    %72 = vector.broadcast %cst_19 : f32 to vector<1x128xf32>
    %73 = arith.cmpf ogt, %2, %72 : vector<1x128xf32>
    %cst_20 = arith.constant 0.000000e+00 : f32
    %74 = vector.shape_cast %73 : vector<1x128xi1> to vector<1x128xi1>
    %75 = vector.broadcast %74 : vector<1x128xi1> to vector<32x128xi1>
    %76 = vector.broadcast %cst_20 : f32 to vector<32x128xf32>
    %77 = arith.select %75, %71, %76 : vector<32x128xi1>, vector<32x128xf32>
    %78 = vector.broadcast %44 : vector<32x1xf32> to vector<32x128xf32>
    %79 = arith.addf %77, %78 : vector<32x128xf32>
    %cst_21 = arith.constant 0.000000e+00 : f32
    %80 = vector.broadcast %cst_21 : f32 to vector<32x128xf32>
    %81 = arith.maximumf %79, %80 : vector<32x128xf32>
    %82 = arith.maximumf %69, %81 : vector<32x128xf32>
    %83 = vector.extract_strided_slice %43 {offsets = [0, 384], sizes = [32, 128], strides = [1, 1]} : vector<32x2048xf32> to vector<32x128xf32>
    %84 = arith.addf %83, %41 : vector<32x128xf32>
    %cst_22 = arith.constant 3.000000e+00 : f32
    %85 = vector.broadcast %cst_22 : f32 to vector<1x128xf32>
    %86 = arith.cmpf ogt, %2, %85 : vector<1x128xf32>
    %cst_23 = arith.constant 0.000000e+00 : f32
    %87 = vector.shape_cast %86 : vector<1x128xi1> to vector<1x128xi1>
    %88 = vector.broadcast %87 : vector<1x128xi1> to vector<32x128xi1>
    %89 = vector.broadcast %cst_23 : f32 to vector<32x128xf32>
    %90 = arith.select %88, %84, %89 : vector<32x128xi1>, vector<32x128xf32>
    %91 = vector.broadcast %44 : vector<32x1xf32> to vector<32x128xf32>
    %92 = arith.addf %90, %91 : vector<32x128xf32>
    %cst_24 = arith.constant 0.000000e+00 : f32
    %93 = vector.broadcast %cst_24 : f32 to vector<32x128xf32>
    %94 = arith.maximumf %92, %93 : vector<32x128xf32>
    %95 = arith.maximumf %82, %94 : vector<32x128xf32>
    %96 = vector.extract_strided_slice %43 {offsets = [0, 512], sizes = [32, 128], strides = [1, 1]} : vector<32x2048xf32> to vector<32x128xf32>
    %97 = arith.addf %96, %41 : vector<32x128xf32>
    %cst_25 = arith.constant 4.000000e+00 : f32
    %98 = vector.broadcast %cst_25 : f32 to vector<1x128xf32>
    %99 = arith.cmpf ogt, %2, %98 : vector<1x128xf32>
    %cst_26 = arith.constant 0.000000e+00 : f32
    %100 = vector.shape_cast %99 : vector<1x128xi1> to vector<1x128xi1>
    %101 = vector.broadcast %100 : vector<1x128xi1> to vector<32x128xi1>
    %102 = vector.broadcast %cst_26 : f32 to vector<32x128xf32>
    %103 = arith.select %101, %97, %102 : vector<32x128xi1>, vector<32x128xf32>
    %104 = vector.broadcast %44 : vector<32x1xf32> to vector<32x128xf32>
    %105 = arith.addf %103, %104 : vector<32x128xf32>
    %cst_27 = arith.constant 0.000000e+00 : f32
    %106 = vector.broadcast %cst_27 : f32 to vector<32x128xf32>
    %107 = arith.maximumf %105, %106 : vector<32x128xf32>
    %108 = arith.maximumf %95, %107 : vector<32x128xf32>
    %109 = vector.extract_strided_slice %43 {offsets = [0, 640], sizes = [32, 128], strides = [1, 1]} : vector<32x2048xf32> to vector<32x128xf32>
    %110 = arith.addf %109, %41 : vector<32x128xf32>
    %cst_28 = arith.constant 5.000000e+00 : f32
    %111 = vector.broadcast %cst_28 : f32 to vector<1x128xf32>
    %112 = arith.cmpf ogt, %2, %111 : vector<1x128xf32>
    %cst_29 = arith.constant 0.000000e+00 : f32
    %113 = vector.shape_cast %112 : vector<1x128xi1> to vector<1x128xi1>
    %114 = vector.broadcast %113 : vector<1x128xi1> to vector<32x128xi1>
    %115 = vector.broadcast %cst_29 : f32 to vector<32x128xf32>
    %116 = arith.select %114, %110, %115 : vector<32x128xi1>, vector<32x128xf32>
    %117 = vector.broadcast %44 : vector<32x1xf32> to vector<32x128xf32>
    %118 = arith.addf %116, %117 : vector<32x128xf32>
    %cst_30 = arith.constant 0.000000e+00 : f32
    %119 = vector.broadcast %cst_30 : f32 to vector<32x128xf32>
    %120 = arith.maximumf %118, %119 : vector<32x128xf32>
    %121 = arith.maximumf %108, %120 : vector<32x128xf32>
    %122 = vector.extract_strided_slice %43 {offsets = [0, 768], sizes = [32, 128], strides = [1, 1]} : vector<32x2048xf32> to vector<32x128xf32>
    %123 = arith.addf %122, %41 : vector<32x128xf32>
    %cst_31 = arith.constant 6.000000e+00 : f32
    %124 = vector.broadcast %cst_31 : f32 to vector<1x128xf32>
    %125 = arith.cmpf ogt, %2, %124 : vector<1x128xf32>
    %cst_32 = arith.constant 0.000000e+00 : f32
    %126 = vector.shape_cast %125 : vector<1x128xi1> to vector<1x128xi1>
    %127 = vector.broadcast %126 : vector<1x128xi1> to vector<32x128xi1>
    %128 = vector.broadcast %cst_32 : f32 to vector<32x128xf32>
    %129 = arith.select %127, %123, %128 : vector<32x128xi1>, vector<32x128xf32>
    %130 = vector.broadcast %44 : vector<32x1xf32> to vector<32x128xf32>
    %131 = arith.addf %129, %130 : vector<32x128xf32>
    %cst_33 = arith.constant 0.000000e+00 : f32
    %132 = vector.broadcast %cst_33 : f32 to vector<32x128xf32>
    %133 = arith.maximumf %131, %132 : vector<32x128xf32>
    %134 = arith.maximumf %121, %133 : vector<32x128xf32>
    %135 = vector.extract_strided_slice %43 {offsets = [0, 896], sizes = [32, 128], strides = [1, 1]} : vector<32x2048xf32> to vector<32x128xf32>
    %136 = arith.addf %135, %41 : vector<32x128xf32>
    %cst_34 = arith.constant 7.000000e+00 : f32
    %137 = vector.broadcast %cst_34 : f32 to vector<1x128xf32>
    %138 = arith.cmpf ogt, %2, %137 : vector<1x128xf32>
    %cst_35 = arith.constant 0.000000e+00 : f32
    %139 = vector.shape_cast %138 : vector<1x128xi1> to vector<1x128xi1>
    %140 = vector.broadcast %139 : vector<1x128xi1> to vector<32x128xi1>
    %141 = vector.broadcast %cst_35 : f32 to vector<32x128xf32>
    %142 = arith.select %140, %136, %141 : vector<32x128xi1>, vector<32x128xf32>
    %143 = vector.broadcast %44 : vector<32x1xf32> to vector<32x128xf32>
    %144 = arith.addf %142, %143 : vector<32x128xf32>
    %cst_36 = arith.constant 0.000000e+00 : f32
    %145 = vector.broadcast %cst_36 : f32 to vector<32x128xf32>
    %146 = arith.maximumf %144, %145 : vector<32x128xf32>
    %147 = arith.maximumf %134, %146 : vector<32x128xf32>
    %148 = vector.extract_strided_slice %43 {offsets = [0, 1024], sizes = [32, 128], strides = [1, 1]} : vector<32x2048xf32> to vector<32x128xf32>
    %149 = arith.addf %148, %41 : vector<32x128xf32>
    %cst_37 = arith.constant 8.000000e+00 : f32
    %150 = vector.broadcast %cst_37 : f32 to vector<1x128xf32>
    %151 = arith.cmpf ogt, %2, %150 : vector<1x128xf32>
    %cst_38 = arith.constant 0.000000e+00 : f32
    %152 = vector.shape_cast %151 : vector<1x128xi1> to vector<1x128xi1>
    %153 = vector.broadcast %152 : vector<1x128xi1> to vector<32x128xi1>
    %154 = vector.broadcast %cst_38 : f32 to vector<32x128xf32>
    %155 = arith.select %153, %149, %154 : vector<32x128xi1>, vector<32x128xf32>
    %156 = vector.broadcast %44 : vector<32x1xf32> to vector<32x128xf32>
    %157 = arith.addf %155, %156 : vector<32x128xf32>
    %cst_39 = arith.constant 0.000000e+00 : f32
    %158 = vector.broadcast %cst_39 : f32 to vector<32x128xf32>
    %159 = arith.maximumf %157, %158 : vector<32x128xf32>
    %160 = arith.maximumf %147, %159 : vector<32x128xf32>
    %161 = vector.extract_strided_slice %43 {offsets = [0, 1152], sizes = [32, 128], strides = [1, 1]} : vector<32x2048xf32> to vector<32x128xf32>
    %162 = arith.addf %161, %41 : vector<32x128xf32>
    %cst_40 = arith.constant 9.000000e+00 : f32
    %163 = vector.broadcast %cst_40 : f32 to vector<1x128xf32>
    %164 = arith.cmpf ogt, %2, %163 : vector<1x128xf32>
    %cst_41 = arith.constant 0.000000e+00 : f32
    %165 = vector.shape_cast %164 : vector<1x128xi1> to vector<1x128xi1>
    %166 = vector.broadcast %165 : vector<1x128xi1> to vector<32x128xi1>
    %167 = vector.broadcast %cst_41 : f32 to vector<32x128xf32>
    %168 = arith.select %166, %162, %167 : vector<32x128xi1>, vector<32x128xf32>
    %169 = vector.broadcast %44 : vector<32x1xf32> to vector<32x128xf32>
    %170 = arith.addf %168, %169 : vector<32x128xf32>
    %cst_42 = arith.constant 0.000000e+00 : f32
    %171 = vector.broadcast %cst_42 : f32 to vector<32x128xf32>
    %172 = arith.maximumf %170, %171 : vector<32x128xf32>
    %173 = arith.maximumf %160, %172 : vector<32x128xf32>
    %174 = vector.extract_strided_slice %43 {offsets = [0, 1280], sizes = [32, 128], strides = [1, 1]} : vector<32x2048xf32> to vector<32x128xf32>
    %175 = arith.addf %174, %41 : vector<32x128xf32>
    %cst_43 = arith.constant 1.000000e+01 : f32
    %176 = vector.broadcast %cst_43 : f32 to vector<1x128xf32>
    %177 = arith.cmpf ogt, %2, %176 : vector<1x128xf32>
    %cst_44 = arith.constant 0.000000e+00 : f32
    %178 = vector.shape_cast %177 : vector<1x128xi1> to vector<1x128xi1>
    %179 = vector.broadcast %178 : vector<1x128xi1> to vector<32x128xi1>
    %180 = vector.broadcast %cst_44 : f32 to vector<32x128xf32>
    %181 = arith.select %179, %175, %180 : vector<32x128xi1>, vector<32x128xf32>
    %182 = vector.broadcast %44 : vector<32x1xf32> to vector<32x128xf32>
    %183 = arith.addf %181, %182 : vector<32x128xf32>
    %cst_45 = arith.constant 0.000000e+00 : f32
    %184 = vector.broadcast %cst_45 : f32 to vector<32x128xf32>
    %185 = arith.maximumf %183, %184 : vector<32x128xf32>
    %186 = arith.maximumf %173, %185 : vector<32x128xf32>
    %187 = vector.extract_strided_slice %43 {offsets = [0, 1408], sizes = [32, 128], strides = [1, 1]} : vector<32x2048xf32> to vector<32x128xf32>
    %188 = arith.addf %187, %41 : vector<32x128xf32>
    %cst_46 = arith.constant 1.100000e+01 : f32
    %189 = vector.broadcast %cst_46 : f32 to vector<1x128xf32>
    %190 = arith.cmpf ogt, %2, %189 : vector<1x128xf32>
    %cst_47 = arith.constant 0.000000e+00 : f32
    %191 = vector.shape_cast %190 : vector<1x128xi1> to vector<1x128xi1>
    %192 = vector.broadcast %191 : vector<1x128xi1> to vector<32x128xi1>
    %193 = vector.broadcast %cst_47 : f32 to vector<32x128xf32>
    %194 = arith.select %192, %188, %193 : vector<32x128xi1>, vector<32x128xf32>
    %195 = vector.broadcast %44 : vector<32x1xf32> to vector<32x128xf32>
    %196 = arith.addf %194, %195 : vector<32x128xf32>
    %cst_48 = arith.constant 0.000000e+00 : f32
    %197 = vector.broadcast %cst_48 : f32 to vector<32x128xf32>
    %198 = arith.maximumf %196, %197 : vector<32x128xf32>
    %199 = arith.maximumf %186, %198 : vector<32x128xf32>
    %200 = vector.extract_strided_slice %43 {offsets = [0, 1536], sizes = [32, 128], strides = [1, 1]} : vector<32x2048xf32> to vector<32x128xf32>
    %201 = arith.addf %200, %41 : vector<32x128xf32>
    %cst_49 = arith.constant 1.200000e+01 : f32
    %202 = vector.broadcast %cst_49 : f32 to vector<1x128xf32>
    %203 = arith.cmpf ogt, %2, %202 : vector<1x128xf32>
    %cst_50 = arith.constant 0.000000e+00 : f32
    %204 = vector.shape_cast %203 : vector<1x128xi1> to vector<1x128xi1>
    %205 = vector.broadcast %204 : vector<1x128xi1> to vector<32x128xi1>
    %206 = vector.broadcast %cst_50 : f32 to vector<32x128xf32>
    %207 = arith.select %205, %201, %206 : vector<32x128xi1>, vector<32x128xf32>
    %208 = vector.broadcast %44 : vector<32x1xf32> to vector<32x128xf32>
    %209 = arith.addf %207, %208 : vector<32x128xf32>
    %cst_51 = arith.constant 0.000000e+00 : f32
    %210 = vector.broadcast %cst_51 : f32 to vector<32x128xf32>
    %211 = arith.maximumf %209, %210 : vector<32x128xf32>
    %212 = arith.maximumf %199, %211 : vector<32x128xf32>
    %213 = vector.extract_strided_slice %43 {offsets = [0, 1664], sizes = [32, 128], strides = [1, 1]} : vector<32x2048xf32> to vector<32x128xf32>
    %214 = arith.addf %213, %41 : vector<32x128xf32>
    %cst_52 = arith.constant 1.300000e+01 : f32
    %215 = vector.broadcast %cst_52 : f32 to vector<1x128xf32>
    %216 = arith.cmpf ogt, %2, %215 : vector<1x128xf32>
    %cst_53 = arith.constant 0.000000e+00 : f32
    %217 = vector.shape_cast %216 : vector<1x128xi1> to vector<1x128xi1>
    %218 = vector.broadcast %217 : vector<1x128xi1> to vector<32x128xi1>
    %219 = vector.broadcast %cst_53 : f32 to vector<32x128xf32>
    %220 = arith.select %218, %214, %219 : vector<32x128xi1>, vector<32x128xf32>
    %221 = vector.broadcast %44 : vector<32x1xf32> to vector<32x128xf32>
    %222 = arith.addf %220, %221 : vector<32x128xf32>
    %cst_54 = arith.constant 0.000000e+00 : f32
    %223 = vector.broadcast %cst_54 : f32 to vector<32x128xf32>
    %224 = arith.maximumf %222, %223 : vector<32x128xf32>
    %225 = arith.maximumf %212, %224 : vector<32x128xf32>
    %226 = vector.extract_strided_slice %43 {offsets = [0, 1792], sizes = [32, 128], strides = [1, 1]} : vector<32x2048xf32> to vector<32x128xf32>
    %227 = arith.addf %226, %41 : vector<32x128xf32>
    %cst_55 = arith.constant 1.400000e+01 : f32
    %228 = vector.broadcast %cst_55 : f32 to vector<1x128xf32>
    %229 = arith.cmpf ogt, %2, %228 : vector<1x128xf32>
    %cst_56 = arith.constant 0.000000e+00 : f32
    %230 = vector.shape_cast %229 : vector<1x128xi1> to vector<1x128xi1>
    %231 = vector.broadcast %230 : vector<1x128xi1> to vector<32x128xi1>
    %232 = vector.broadcast %cst_56 : f32 to vector<32x128xf32>
    %233 = arith.select %231, %227, %232 : vector<32x128xi1>, vector<32x128xf32>
    %234 = vector.broadcast %44 : vector<32x1xf32> to vector<32x128xf32>
    %235 = arith.addf %233, %234 : vector<32x128xf32>
    %cst_57 = arith.constant 0.000000e+00 : f32
    %236 = vector.broadcast %cst_57 : f32 to vector<32x128xf32>
    %237 = arith.maximumf %235, %236 : vector<32x128xf32>
    %238 = arith.maximumf %225, %237 : vector<32x128xf32>
    %239 = vector.extract_strided_slice %43 {offsets = [0, 1920], sizes = [32, 128], strides = [1, 1]} : vector<32x2048xf32> to vector<32x128xf32>
    %240 = arith.addf %239, %41 : vector<32x128xf32>
    %cst_58 = arith.constant 1.500000e+01 : f32
    %241 = vector.broadcast %cst_58 : f32 to vector<1x128xf32>
    %242 = arith.cmpf ogt, %2, %241 : vector<1x128xf32>
    %cst_59 = arith.constant 0.000000e+00 : f32
    %243 = vector.shape_cast %242 : vector<1x128xi1> to vector<1x128xi1>
    %244 = vector.broadcast %243 : vector<1x128xi1> to vector<32x128xi1>
    %245 = vector.broadcast %cst_59 : f32 to vector<32x128xf32>
    %246 = arith.select %244, %240, %245 : vector<32x128xi1>, vector<32x128xf32>
    %247 = vector.broadcast %44 : vector<32x1xf32> to vector<32x128xf32>
    %248 = arith.addf %246, %247 : vector<32x128xf32>
    %cst_60 = arith.constant 0.000000e+00 : f32
    %249 = vector.broadcast %cst_60 : f32 to vector<32x128xf32>
    %250 = arith.maximumf %248, %249 : vector<32x128xf32>
    %251 = arith.maximumf %238, %250 : vector<32x128xf32>
    %c0_61 = arith.constant 0 : index
    %c0_62 = arith.constant 0 : index
    %252 = vector.load %arg8[%c0_61, %c0_62] : memref<64x32xf32, #tpu.memory_space<vmem>>, vector<64x32xf32>
    %cst_63 = arith.constant dense<0.000000e+00> : vector<64x128xf32>
    %253 = tpu.matmul %252, %251, %cst_63 {dimension_numbers = #tpu.dot_dimension_numbers<[1], [0], [0], [1], [0, 0, 1, 1], [], []>} : vector<64x32xf32>, vector<32x128xf32>, vector<64x128xf32> -> vector<64x128xf32>
    %c0_64 = arith.constant 0 : index
    %c0_65 = arith.constant 0 : index
    %254 = vector.load %arg9[%c0_64, %c0_65] : memref<64x1xf32, #tpu.memory_space<vmem>>, vector<64x1xf32>
    %255 = vector.broadcast %254 : vector<64x1xf32> to vector<64x128xf32>
    %256 = arith.addf %253, %255 : vector<64x128xf32>
    %c0_66 = arith.constant 0 : index
    %c0_67 = arith.constant 0 : index
    %257 = vector.load %arg7[%c0_66, %c0_67] : memref<64x32xf32, #tpu.memory_space<vmem>>, vector<64x32xf32>
    %cst_68 = arith.constant dense<0.000000e+00> : vector<64x128xf32>
    %258 = tpu.matmul %257, %56, %cst_68 {dimension_numbers = #tpu.dot_dimension_numbers<[1], [0], [0], [1], [0, 0, 1, 1], [], []>} : vector<64x32xf32>, vector<32x128xf32>, vector<64x128xf32> -> vector<64x128xf32>
    %cst_69 = arith.constant dense<0.000000e+00> : vector<64x128xf32>
    %259 = tpu.matmul %257, %68, %cst_69 {dimension_numbers = #tpu.dot_dimension_numbers<[1], [0], [0], [1], [0, 0, 1, 1], [], []>} : vector<64x32xf32>, vector<32x128xf32>, vector<64x128xf32> -> vector<64x128xf32>
    %260 = arith.maximumf %258, %259 : vector<64x128xf32>
    %cst_70 = arith.constant dense<0.000000e+00> : vector<64x128xf32>
    %261 = tpu.matmul %257, %81, %cst_70 {dimension_numbers = #tpu.dot_dimension_numbers<[1], [0], [0], [1], [0, 0, 1, 1], [], []>} : vector<64x32xf32>, vector<32x128xf32>, vector<64x128xf32> -> vector<64x128xf32>
    %262 = arith.maximumf %260, %261 : vector<64x128xf32>
    %cst_71 = arith.constant dense<0.000000e+00> : vector<64x128xf32>
    %263 = tpu.matmul %257, %94, %cst_71 {dimension_numbers = #tpu.dot_dimension_numbers<[1], [0], [0], [1], [0, 0, 1, 1], [], []>} : vector<64x32xf32>, vector<32x128xf32>, vector<64x128xf32> -> vector<64x128xf32>
    %264 = arith.maximumf %262, %263 : vector<64x128xf32>
    %cst_72 = arith.constant dense<0.000000e+00> : vector<64x128xf32>
    %265 = tpu.matmul %257, %107, %cst_72 {dimension_numbers = #tpu.dot_dimension_numbers<[1], [0], [0], [1], [0, 0, 1, 1], [], []>} : vector<64x32xf32>, vector<32x128xf32>, vector<64x128xf32> -> vector<64x128xf32>
    %266 = arith.maximumf %264, %265 : vector<64x128xf32>
    %cst_73 = arith.constant dense<0.000000e+00> : vector<64x128xf32>
    %267 = tpu.matmul %257, %120, %cst_73 {dimension_numbers = #tpu.dot_dimension_numbers<[1], [0], [0], [1], [0, 0, 1, 1], [], []>} : vector<64x32xf32>, vector<32x128xf32>, vector<64x128xf32> -> vector<64x128xf32>
    %268 = arith.maximumf %266, %267 : vector<64x128xf32>
    %cst_74 = arith.constant dense<0.000000e+00> : vector<64x128xf32>
    %269 = tpu.matmul %257, %133, %cst_74 {dimension_numbers = #tpu.dot_dimension_numbers<[1], [0], [0], [1], [0, 0, 1, 1], [], []>} : vector<64x32xf32>, vector<32x128xf32>, vector<64x128xf32> -> vector<64x128xf32>
    %270 = arith.maximumf %268, %269 : vector<64x128xf32>
    %cst_75 = arith.constant dense<0.000000e+00> : vector<64x128xf32>
    %271 = tpu.matmul %257, %146, %cst_75 {dimension_numbers = #tpu.dot_dimension_numbers<[1], [0], [0], [1], [0, 0, 1, 1], [], []>} : vector<64x32xf32>, vector<32x128xf32>, vector<64x128xf32> -> vector<64x128xf32>
    %272 = arith.maximumf %270, %271 : vector<64x128xf32>
    %cst_76 = arith.constant dense<0.000000e+00> : vector<64x128xf32>
    %273 = tpu.matmul %257, %159, %cst_76 {dimension_numbers = #tpu.dot_dimension_numbers<[1], [0], [0], [1], [0, 0, 1, 1], [], []>} : vector<64x32xf32>, vector<32x128xf32>, vector<64x128xf32> -> vector<64x128xf32>
    %274 = arith.maximumf %272, %273 : vector<64x128xf32>
    %cst_77 = arith.constant dense<0.000000e+00> : vector<64x128xf32>
    %275 = tpu.matmul %257, %172, %cst_77 {dimension_numbers = #tpu.dot_dimension_numbers<[1], [0], [0], [1], [0, 0, 1, 1], [], []>} : vector<64x32xf32>, vector<32x128xf32>, vector<64x128xf32> -> vector<64x128xf32>
    %276 = arith.maximumf %274, %275 : vector<64x128xf32>
    %cst_78 = arith.constant dense<0.000000e+00> : vector<64x128xf32>
    %277 = tpu.matmul %257, %185, %cst_78 {dimension_numbers = #tpu.dot_dimension_numbers<[1], [0], [0], [1], [0, 0, 1, 1], [], []>} : vector<64x32xf32>, vector<32x128xf32>, vector<64x128xf32> -> vector<64x128xf32>
    %278 = arith.maximumf %276, %277 : vector<64x128xf32>
    %cst_79 = arith.constant dense<0.000000e+00> : vector<64x128xf32>
    %279 = tpu.matmul %257, %198, %cst_79 {dimension_numbers = #tpu.dot_dimension_numbers<[1], [0], [0], [1], [0, 0, 1, 1], [], []>} : vector<64x32xf32>, vector<32x128xf32>, vector<64x128xf32> -> vector<64x128xf32>
    %280 = arith.maximumf %278, %279 : vector<64x128xf32>
    %cst_80 = arith.constant dense<0.000000e+00> : vector<64x128xf32>
    %281 = tpu.matmul %257, %211, %cst_80 {dimension_numbers = #tpu.dot_dimension_numbers<[1], [0], [0], [1], [0, 0, 1, 1], [], []>} : vector<64x32xf32>, vector<32x128xf32>, vector<64x128xf32> -> vector<64x128xf32>
    %282 = arith.maximumf %280, %281 : vector<64x128xf32>
    %cst_81 = arith.constant dense<0.000000e+00> : vector<64x128xf32>
    %283 = tpu.matmul %257, %224, %cst_81 {dimension_numbers = #tpu.dot_dimension_numbers<[1], [0], [0], [1], [0, 0, 1, 1], [], []>} : vector<64x32xf32>, vector<32x128xf32>, vector<64x128xf32> -> vector<64x128xf32>
    %284 = arith.maximumf %282, %283 : vector<64x128xf32>
    %cst_82 = arith.constant dense<0.000000e+00> : vector<64x128xf32>
    %285 = tpu.matmul %257, %237, %cst_82 {dimension_numbers = #tpu.dot_dimension_numbers<[1], [0], [0], [1], [0, 0, 1, 1], [], []>} : vector<64x32xf32>, vector<32x128xf32>, vector<64x128xf32> -> vector<64x128xf32>
    %286 = arith.maximumf %284, %285 : vector<64x128xf32>
    %cst_83 = arith.constant dense<0.000000e+00> : vector<64x128xf32>
    %287 = tpu.matmul %257, %250, %cst_83 {dimension_numbers = #tpu.dot_dimension_numbers<[1], [0], [0], [1], [0, 0, 1, 1], [], []>} : vector<64x32xf32>, vector<32x128xf32>, vector<64x128xf32> -> vector<64x128xf32>
    %288 = arith.maximumf %286, %287 : vector<64x128xf32>
    %289 = arith.addf %288, %256 : vector<64x128xf32>
    %cst_84 = arith.constant 0.000000e+00 : f32
    %290 = vector.broadcast %cst_84 : f32 to vector<64x128xf32>
    %291 = arith.maximumf %289, %290 : vector<64x128xf32>
    %c0_85 = arith.constant 0 : index
    %c0_86 = arith.constant 0 : index
    %292 = vector.load %arg10[%c0_85, %c0_86] : memref<64x128xf32, #tpu.memory_space<vmem>>, vector<64x128xf32>
    tpu.vector_store %arg10[%c0_85, %c0_86], %291 {strides = array<i32>} : memref<64x128xf32, #tpu.memory_space<vmem>>, vector<64x128xf32>,
    return
  }
  func.func @transform_0(%arg0: i32) -> (i32, i32) {
    %c0_i32 = arith.constant 0 : i32
    %c0_i32_0 = arith.constant 0 : i32
    return %c0_i32, %arg0 : i32, i32
  }
  func.func @transform_1(%arg0: i32) -> (i32, i32) {
    %c0_i32 = arith.constant 0 : i32
    %c0_i32_0 = arith.constant 0 : i32
    return %c0_i32, %arg0 : i32, i32
  }
  func.func @transform_2(%arg0: i32) -> (i32, i32) {
    %c0_i32 = arith.constant 0 : i32
    %c0_i32_0 = arith.constant 0 : i32
    %c0_i32_1 = arith.constant 0 : i32
    return %c0_i32, %c0_i32_0 : i32, i32
  }
  func.func @transform_3(%arg0: i32) -> (i32, i32) {
    %c0_i32 = arith.constant 0 : i32
    %c0_i32_0 = arith.constant 0 : i32
    %c0_i32_1 = arith.constant 0 : i32
    return %c0_i32, %c0_i32_0 : i32, i32
  }
  func.func @transform_4(%arg0: i32) -> (i32, i32) {
    %c0_i32 = arith.constant 0 : i32
    %c0_i32_0 = arith.constant 0 : i32
    %c0_i32_1 = arith.constant 0 : i32
    return %c0_i32, %c0_i32_0 : i32, i32
  }
  func.func @transform_5(%arg0: i32) -> (i32, i32) {
    %c0_i32 = arith.constant 0 : i32
    %c0_i32_0 = arith.constant 0 : i32
    %c0_i32_1 = arith.constant 0 : i32
    return %c0_i32, %c0_i32_0 : i32, i32
  }
  func.func @transform_6(%arg0: i32) -> (i32, i32) {
    %c0_i32 = arith.constant 0 : i32
    %c0_i32_0 = arith.constant 0 : i32
    %c0_i32_1 = arith.constant 0 : i32
    return %c0_i32, %c0_i32_0 : i32, i32
  }
  func.func @transform_7(%arg0: i32) -> (i32, i32) {
    %c0_i32 = arith.constant 0 : i32
    %c0_i32_0 = arith.constant 0 : i32
    %c0_i32_1 = arith.constant 0 : i32
    return %c0_i32, %c0_i32_0 : i32, i32
  }
  func.func @transform_8(%arg0: i32) -> (i32, i32) {
    %c0_i32 = arith.constant 0 : i32
    %c0_i32_0 = arith.constant 0 : i32
    %c0_i32_1 = arith.constant 0 : i32
    return %c0_i32, %c0_i32_0 : i32, i32
  }
  func.func @transform_9(%arg0: i32) -> (i32, i32) {
    %c0_i32 = arith.constant 0 : i32
    %c0_i32_0 = arith.constant 0 : i32
    return %c0_i32, %arg0 : i32, i32
  }
}

</mosaic_0001>

<bundles_post_ra>
// kernel: tpu_custom_call.1
= control target key start
LH: loop header
LB: loop body
LE: loop exit
PB: predicated region body
PF: predicated region fallthrough
CT: control target
= control target key end

     0   :  { %14 = vsyncpa [#allocation3], 0  ;;  %s6943_s0 = inlined_call_operand.vmem [shape: f32[4,4096], index: 0, kind: input, shape index: {}]   ;;  %s6944_s1 = inlined_call_operand.vmem [shape: f32[8,256], index: 1, kind: input, shape index: {}]   ;;  %s6945_s2 = inlined_call_operand.vmem [shape: f32[32,4], index: 2, kind: input, shape index: {}]   ;;  %s6946_s3 = inlined_call_operand.vmem [shape: f32[32,4], index: 3, kind: input, shape index: {}]   ;;  %s6947_s4 = inlined_call_operand.vmem [shape: f32[32,8], index: 4, kind: input, shape index: {}]   ;;  %s6948_s5 = inlined_call_operand.vmem [shape: f32[32,1], index: 5, kind: input, shape index: {}]   ;;  %s6949_s6 = inlined_call_operand.vmem [shape: f32[64,32], index: 6, kind: input, shape index: {}]   ;;  %s6950_s7 = inlined_call_operand.vmem [shape: f32[64,32], index: 7, kind: input, shape index: {}]   ;;  %s6951_s8 = inlined_call_operand.vmem [shape: f32[64,1], index: 8, kind: input, shape index: {}]   ;;  %s6952_s9 = inlined_call_operand.hbm [shape: f32[64,256], index: 9, kind: output, shape index: {}]  }
   0x1   :  { %16 = vsyncpa [#allocation3 + $0x1], 0  ;;  %s5050_s30 = smov 0   ;;  %s5052_s10 = smov 0  }
   0x2   :  { %s5054_s11 = smov 0   ;;  %s5056_s12 = smov 0  }
   0x3 LB: > { %s5071_s13 = sadd.s32 4294967295, %s4992_s12   ;;  %s3960_s14 = sadd.s32 4294967294, %s4992_s12   ;;  %s4992_s12 = sphi %s5056_s12, %s7185_s12   ;;  %s4988_s11 = sphi %s5054_s11, %s7184_s11   ;;  %s4984_s10 = sphi %s5052_s10, %s7183_s10   ;;  %s4980_s30 = sphi %s5050_s30, %s7182_s30  }
   0x4   : > { %s5075_s15 = sadd.s32 1, %s4992_s12   ;;  %s228_s16 = sadd.s32 1, %s4988_s11 }
   0x5   : > { %s225_s17 = ssub.s32 %s4992_s12, %s5075_s15  ;;  %p238_p0 = scmp.ne.s32.totalorder %s4988_s11, %s4984_s10 }
   0x6   : > { %p226_p1 = scmp.eq.s32.totalorder %s225_s17, 0  ;;  %p239_p2 = scmp.eq.s32.totalorder %s5071_s13, 1 }
   0x7   : > { %p244_p3 = scmp.ne.s32.totalorder %s4984_s10, %s4980_s30  ;;  %p245_p4 = scmp.eq.s32.totalorder %s3960_s14, 1 }
   0x8   : > { %s5086_s18 = scalar_select %p226_p1, %s4988_s11, %s228_s16  }
   0x9   : > { %p5088_p5 = por %p239_p2, %p238_p0  ;;  %p5092_p6 = por %p245_p4, %p244_p3 }
   0xa   : > { %7008 = sst [smem:[#allocation5_spill]] %s5086_s18  ;;  %p3963_p7 = scmp.ge.s32.totalorder %s4992_s12, 1 }
   0xb   : > { %p300_p8 = scmp.lt.s32.totalorder %s4992_s12, 3 }
   0xd   : > { %p301_p9 = pnand %p3963_p7, %p300_p8 }
   0xf   : > { %304 = sbr.rel (%p301_p9) target bundleno = 758 (0x2f6), region = 56 }
  0x16   : > { %s3965_s21 = sshll.u32 %s5071_s13, 4  ;;  %v4994_v0 = vmov 0.0   ;;  %p346_p11 = scmp.lt.s32.totalorder %s5071_s13, 1  ;;  %v407_v1 = vld [vmem:[%s6947_s4] sm:$0xff]  ;;  %vm411_vm0 = vcmask 64512   ;;  %v4995_v2 = vmov 0   ;;  %v398_v43 = vlaneseq }
  0x17   : > { %p341_p10 = scmp.lt.s32.totalorder %s3965_s21, 31  ;;  %731 = vmatprep.mubr.f32.mxu1 %v4994_v0  ;;  %4381 = vmatprep.mubr.msk.f32.mxu0 %vm411_vm0, %v407_v1  ;;  %v1379_v3 = vld [vmem:[%s6948_s5] sm:$0xff]  ;;  %v1381_v4 = vld [vmem:[%s6948_s5 + $0x10] sm:$0xff]  ;;  %v1380_v5 = vld [vmem:[%s6948_s5 + $0x8] sm:$0xff]  ;;  %vm522_vm1 = vcmask 1043456   ;;  %vm509_vm2 = vcmask 31744  }
  0x18   : > { %4919 = vset.pattern.permute.xlu0 %v4995_v2  ;;  %4920 = vset.pattern.permute.xlu1 %v4995_v2  ;;  %s347_s24 = scalar_select %p346_p11, %s5071_s13, 1  ;;  %v408_v12 = vld [vmem:[%s6947_s4 + $0x8] sm:$0xff]  ;;  %v5138_v13 = vld [vmem:[%s6945_s2] sm:$0xff]  ;;  %v409_v18 = vld [vmem:[%s6947_s4 + $0x10] sm:$0xff]  ;;  %v5227_v51 = vshrl.u32 %v398_v43, 7  ;;  %vm1887_vm3 = vcmask 261120  }
  0x19   : > { %s7187_s21 = smov (!%p341_p10, %s3965_s21), 31  ;;  %1400 = vperm.xlu0 %4919, %v1379_v3   ;;  %1410 = vperm.xlu1 %4920, %v1381_v4   ;;  %v410_v21 = vld [vmem:[%s6947_s4 + $0x18] sm:$0xff]  ;;  %v5164_v23 = vld [vmem:[%s6945_s2 + $0x8] sm:$0xff]  ;;  %v403_v24 = vld [vmem:[%s6946_s3] sm:$0xff]  ;;  %s337_s25 = sand.u32 1, %s4984_s10  }
  0x1a   : > { %s3966_s29 = sshll.u32 %s7187_s21, 2  ;;  %s3967_s22 = sshll.u32 %s347_s24, 3  ;;  %v1382_v22 = vld [vmem:[%s6948_s5 + $0x18] sm:$0xff]  ;;  %v1839_v27 = vld [vmem:[%s6951_s8] sm:$0xff]  ;;  %v1840_v30 = vld [vmem:[%s6951_s8 + $0x8] sm:$0xff]  ;;  %v400_v57 = vsub.s32 1, %v5227_v51 }
  0x1b   : > { %s5117_s17 = scalar_lea.vmem %s6943_s0, %s3966_s29  ;;  %s349_s26 = scalar_lea.vmem %s6944_s1, %s3967_s22  ;;  %v5189_v31 = vld [vmem:[%s6945_s2 + $0x10] sm:$0xff]  ;;  %v1842_v36 = vld [vmem:[%s6951_s8 + $0x18] sm:$0xff]  ;;  %v1843_v40 = vld [vmem:[%s6951_s8 + $0x20] sm:$0xff] }
  0x1c   : > { %v350_v6 = vld [vmem:[%s5117_s17] sm:$0xff]  ;;  %v5124_v7 = vld [vmem:[%s5117_s17 + $0x8] sm:$0xff]  ;;  %v352_v10 = vld [vmem:[%s5117_s17 + $0x10] sm:$0xff]  ;;  %s4162_s18 = sshll.u32 %s5071_s13, 7  ;;  %s6902_s13 = scalar_lea.sflag [#allocation3], %s337_s25 }
  0x1d   : > { %v360_v8 = vrot.slane %v350_v6, 4  ;;  %v615_v9 = vcombine.high %v350_v6, %v350_v6  ;;  %v5130_v11 = vld [vmem:[%s349_s26] sm:$0xff]  ;;  %v617_v14 = vcombine.high %v352_v10, %v352_v10  ;;  %1405 = vperm.xlu0 %4919, %v1380_v5   ;;  %v365_v16 = vrot.slane %v5124_v7, 4  ;;  %v5176_v28 = vld [vmem:[%s5117_s17 + $0x18] sm:$0xff]  ;;  %1415 = vperm.xlu1 %4920, %v1382_v22   ;;  %v1841_v34 = vld [vmem:[%s6951_s8 + $0x10] sm:$0xff]  ;;  %s3964_s26 = sshll.u32 %s337_s25, 6  ;;  %s6896_s14 = scalar_lea.hbm %s6952_s9, %s4162_s18 }
  0x1e   : > { %4379 = vmatprep.subr.mxu0 %v5130_v11  ;;  %v354_v17 = vld [vmem:[%s5117_s17 + $0x20] sm:$0xff]  ;;  %v370_v26 = vrot.slane %v352_v10, 4  ;;  %v375_v33 = vrot.slane %v5176_v28, 4  ;;  %v5205_v37 = vld [vmem:[%s6945_s2 + $0x18] sm:$0xff]  ;;  %v5211_v41 = vld [vmem:[%s5117_s17 + $0x28] sm:$0xff]  ;;  %v401_v61 = vrot.slane %v5130_v11, %v400_v57  ;;  %v616_v4 = vcombine.high %v5124_v7, %v5124_v7  ;;  %s6877_s27 = scalar_lea.vmem [#allocation2], %s3964_s26 }
  0x1f   : > { %v362_v15 = vadd.f32 %v360_v8, %v350_v6  ;;  %3977 = vmatprep.subr.msk.mxu1 %vm522_vm1, %v615_v9  ;;  %4380 = vmatpush3.msra.mxu0 %v5130_v11  ;;  %v619_v19 = vcombine.high %v354_v17, %v354_v17  ;;  %v380_v39 = vrot.slane %v354_v17, 4  ;;  %v1844_v44 = vld [vmem:[%s6951_s8 + $0x28] sm:$0xff]  ;;  %v356_v45 = vld [vmem:[%s5117_s17 + $0x30] sm:$0xff]  ;;  %v385_v47 = vrot.slane %v5211_v41, 4  ;;  %v1846_v52 = vld [vmem:[%s6951_s8 + $0x38] sm:$0xff]  ;;  %s3886_s24 = sshll.u32 %s6877_s27, 4  ;;  %s6890_s24 = int_to_ptr.vmem [resolvable:$true] %s3886_s24 }
  0x20   : > { %3978 = vmatpush1.msk.msra.mxu1 %vm522_vm1, %v350_v6  ;;  %4382 = vmatmul.mubr.msk.f32.vlgmr.msra.gmra.mrb[0].mxu0 %vm411_vm0, %v408_v12  ;;  %v621_v48 = vcombine.high %v356_v45, %v356_v45  ;;  %v1845_v49 = vld [vmem:[%s6951_s8 + $0x30] sm:$0xff]  ;;  %v390_v54 = vrot.slane %v356_v45, 4  ;;  %v5236_v55 = vld [vmem:[%s5117_s17 + $0x38] sm:$0xff]  ;;  %v404_v1 = vld [vmem:[%s6946_s3 + $0x8] sm:$0xff]  ;;  %v618_v6 = vcombine.high %v5176_v28, %v5176_v28  ;;  %v620_v8 = vcombine.high %v5211_v41, %v5211_v41  ;;  %s4930_s16 = scalar_lea.vmem %s6890_s24, 1024  ;;  %s4996_s22 = smov [#allocation2]  }
  0x21   : > { %v363_v20 = vadd.f32 %v362_v15, %v5124_v7  ;;  %3979 = vmatmul.mubr.msk.f32.vlgmr.msra.gmra.mrb[0].mxu1 %vm509_vm2, %v5138_v13  ;;  %3989 = vmatprep.subr.msk.mxu1 %vm522_vm1, %v617_v14  ;;  %v395_v59 = vrot.slane %v5236_v55, 4  ;;  %v405_v3 = vld [vmem:[%s6946_s3 + $0x10] sm:$0xff]  ;;  %v406_v5 = vld [vmem:[%s6946_s3 + $0x18] sm:$0xff]  ;;  %v5360_v9 = vld [vmem:[%s6949_s6] sm:$0xff]  ;;  %vm1387_vm4 = vcmp.gt.f32.partialorder %v5130_v11, 0.0  ;;  %vm1430_vm5 = vcmp.gt.f32.partialorder %v5130_v11, 1.0  ;;  %p4931_p12 = scmp.ne.s32.totalorder %s6890_s24, %s4930_s16 }
  0x22   : > { %737 = vmatprep.mubr.f32.mxu1 %v4994_v0  ;;  %3990 = vmatpush1.msk.msra.mxu1 %vm522_vm1, %v352_v10  ;;  %vm1646_vm6 = vcmp.gt.f32.partialorder %v5130_v11, 9.0  ;;  %vm1619_vm7 = vcmp.gt.f32.partialorder %v5130_v11, 8.0  ;;  %v1388_v22 = vsel %vm1387_vm4, 1, %v4995_v2  ;;  %vm1457_vm8 = vcmp.gt.f32.partialorder %v5130_v11, 2.0  ;;  %s4934_s23 = sshll.u32 %s4996_s22, 4  ;;  %s4935_s23 = int_to_ptr.vmem [resolvable:$false] %s4934_s23 }
  0x23   : > { %v367_v25 = vadd.f32 %v365_v16, %v363_v20  ;;  %4384 = vmatprep.mubr.msk.f32.mxu0 %vm411_vm0, %v409_v18  ;;  %4001 = vmatprep.subr.msk.mxu1 %vm522_vm1, %v619_v19  ;;  %vm1484_vm9 = vcmp.gt.f32.partialorder %v5130_v11, 3.0  ;;  %vm1511_vm10 = vcmp.gt.f32.partialorder %v5130_v11, 4.0  ;;  %vm1538_vm11 = vcmp.gt.f32.partialorder %v5130_v11, 5.0  ;;  %p4932_p13 = pnand %p4931_p12, %p5088_p5  ;;  %s4936_s21 = scalar_lea.vmem %s4935_s23, 2048 }
  0x24   : > { %4385 = vmatmul.mubr.msk.f32.gmra.mrb[2].mxu0 %vm411_vm0, %v410_v21  ;;  %1849 = vperm.xlu0 %4919, %v1839_v27   ;;  %v5393_v21 = vsub.s32 0, %v5227_v51  ;;  %vm1727_vm12 = vcmp.gt.f32.partialorder %v5130_v11, 12.0  ;;  %vm1754_vm13 = vcmp.gt.f32.partialorder %v5130_v11, 13.0  ;;  %vm1565_vm14 = vcmp.gt.f32.partialorder %v5130_v11, 6.0  ;;  %p4937_p1 = scmp.lt.s32.totalorder %s6890_s24, %s4935_s23  ;;  %p4938_p2 = scmp.lt.s32.totalorder %s4936_s21, %s4930_s16 }
  0x25   : > { %3980 = vmatmul.mubr.msk.f32.gmra.mrb[2].mxu1 %vm509_vm2, %v5164_v23  ;;  %v368_v29 = vadd.f32 %v367_v25, %v352_v10  ;;  %4389 = vmatprep.mubr.msk.f32.mxu0 %vm509_vm2, %v403_v24  ;;  %v1647_v25 = vsel %vm1646_vm6, 1, %v4995_v2  ;;  %vm1592_vm15 = vcmp.gt.f32.partialorder %v5130_v11, 7.0  ;;  %vm1700_vm4 = vcmp.gt.f32.partialorder %v5130_v11, 11.0  ;;  %p4933_p0 = pneg %p4932_p13 }
  0x26   : > { %743 = vmatprep.mubr.f32.mxu1 %v4994_v0  ;;  %1854 = vperm.xlu1 %4920, %v1840_v30   ;;  %v1651_v30 = vrot.slane %v1647_v25, %v5393_v21  ;;  %v5438_v43 = vsel %vm1727_vm12, 1, %v4995_v2  ;;  %vm1808_vm6 = vcmp.gt.f32.partialorder %v5130_v11, 15.0  ;;  %p4939_p3 = por %p4938_p2, %p4937_p1 }
  0x27   : > { %v372_v32 = vadd.f32 %v370_v26, %v368_v29  ;;  %v1620_v26 = vsel %vm1619_vm7, 1, %v4995_v2 }
  0x28   : > { %1859 = vperm.xlu0 %4919, %v1841_v34   ;;  %v1485_v34 = vsel %vm1484_vm9, 1, %v4995_v2  ;;  %vm5461_vm7 = vcmp.eq.s32.totalorder %v1651_v30, 1  ;;  %p4940_p4 = pnand %p4939_p3, %p4933_p0 }
  0x29   : > { %3981 = vmatmul.mubr.msk.f32.gmra.mrb[4].mxu1 %vm509_vm2, %v5189_v31  ;;  %v373_v35 = vadd.f32 %v372_v32, %v5176_v28 }
  0x2a   : > { %749 = vmatprep.mubr.f32.mxu1 %v4994_v0  ;;  %1864 = vperm.xlu1 %4920, %v1842_v36  }
  0x2b   : > { %v377_v38 = vadd.f32 %v375_v33, %v373_v35  ;;  %v1458_v33 = vsel %vm1457_vm8, 1, %v4995_v2 }
  0x2c   : > { %1869 = vperm.xlu0 %4919, %v1843_v40   ;;  %v5430_v40 = vsel %vm1511_vm10, 1, %v4995_v2 }
  0x2d   : > { %3982 = vmatmul.mubr.msk.f32.gmra.mrb[6].mxu1 %vm509_vm2, %v5205_v37  ;;  %v378_v42 = vadd.f32 %v377_v38, %v354_v17  ;;  %v1462_v38 = vrot.slane %v1458_v33, %v5393_v21  ;;  %v7039_v36 = vrot.slane %v5430_v40, %v5393_v21 }
  0x2e   : > { %909 = vmatprep.mubr.f32.mxu1 %v4994_v0  ;;  %1874 = vperm.xlu1 %4920, %v1844_v44   ;;  %v5441_v44 = vsel %vm1754_vm13, 1, %v4995_v2 }
  0x2f   : > { %v382_v46 = vadd.f32 %v380_v39, %v378_v42  ;;  %v1489_v39 = vrot.slane %v1485_v34, %v5393_v21  ;;  %vm5483_vm9 = vcmp.eq.s32.totalorder %v1462_v38, 1  ;;  %vm5685_vm13 = vcmp.eq.s32.totalorder %v7039_v36, 1 }
  0x30   : > { %1879 = vperm.xlu0 %4919, %v1845_v49  }
  0x31   : > { %3991 = vmatmul.mubr.msk.f32.vlgmr.msra.gmra.mrb[8].mxu1 %vm509_vm2, %v5138_v13  ;;  %v383_v50 = vadd.f32 %v382_v46, %v5211_v41  ;;  %v5447_v46 = vsel %vm1592_vm15, 1, %v4995_v2  ;;  %vm5499_vm10 = vcmp.eq.s32.totalorder %v1489_v39, 1 }
  0x32   : > { %915 = vmatprep.mubr.f32.mxu1 %v4994_v0  ;;  %4002 = vmatpush1.msk.msra.mxu1 %vm522_vm1, %v354_v17 }
  0x33   : > { %v387_v53 = vadd.f32 %v385_v47, %v383_v50  ;;  %4013 = vmatprep.subr.msk.mxu1 %vm522_vm1, %v621_v48  ;;  %1884 = vperm.xlu1 %4920, %v1846_v52   ;;  %v5457_v50 = vsel %vm1700_vm4, 1, %v4995_v2 }
  0x35   : > { %3992 = vmatmul.mubr.msk.f32.gmra.mrb[10].mxu1 %vm509_vm2, %v5164_v23  ;;  %v388_v56 = vadd.f32 %v387_v53, %v356_v45 }
  0x36   : > { %921 = vmatprep.mubr.f32.mxu1 %v4994_v0 }
  0x37   : > { %v392_v58 = vadd.f32 %v390_v54, %v388_v56 }
  0x39   : > { %3993 = vmatmul.mubr.msk.f32.gmra.mrb[12].mxu1 %vm509_vm2, %v5189_v31  ;;  %v393_v60 = vadd.f32 %v392_v58, %v5236_v55 }
  0x3a   : > { %927 = vmatprep.mubr.f32.mxu1 %v4994_v0 }
  0x3b   : > { %v397_v62 = vadd.f32 %v395_v59, %v393_v60 }
  0x3d   : > { %3994 = vmatmul.mubr.msk.f32.gmra.mrb[14].mxu1 %vm509_vm2, %v5205_v37  ;;  %v402_v63 = vmul.f32 %v401_v61, %v397_v62 }
  0x3e   : > { %1087 = vmatprep.mubr.f32.mxu1 %v4994_v0 }
  0x3f   : > { %4387 = vmatprep.subr.msk.mxu0 %vm522_vm1, %v402_v63 }
  0x40   : > { %4388 = vmatpush3.msk.msra.mxu0 %vm522_vm1, %v402_v63 }
  0x41   : > { %4390 = vmatmul.mubr.msk.f32.vlgmr.msra.gmra.mrb[0].mxu0 %vm509_vm2, %v404_v1  ;;  %4003 = vmatmul.mubr.msk.f32.vlgmr.msra.gmra.mrb[16].mxu1 %vm509_vm2, %v5138_v13  ;;  %v5495_v1 = vsel %vm1808_vm6, 1, %v4995_v2 }
  0x42   : > { %4392 = vmatprep.mubr.msk.f32.mxu0 %vm509_vm2, %v405_v3  ;;  %1093 = vmatprep.mubr.f32.mxu1 %v4994_v0  ;;  %7021 = vst [vmem:[#allocation6_spill] sm:$0xff] %v5495_v1 }
  0x43   : > { %3983 = vmatprep.subr.msk.mxu0 %vm522_vm1, %v616_v4  ;;  %4014 = vmatpush1.msk.msra.mxu1 %vm522_vm1, %v356_v45  ;;  %v5444_v45 = vsel %vm1565_vm14, 1, %v4995_v2 }
  0x44   : > { %3984 = vmatpush1.msk.msra.mxu0 %vm522_vm1, %v5124_v7  ;;  %v622_v7 = vcombine.high %v5236_v55, %v5236_v55 }
  0x45   : > { %4393 = vmatmul.mubr.msk.f32.gmra.mrb[2].mxu0 %vm509_vm2, %v406_v5  ;;  %4004 = vmatmul.mubr.msk.f32.gmra.mrb[18].mxu1 %vm509_vm2, %v5164_v23 }
  0x46   : > { %820 = vmatprep.mubr.f32.mxu0 %v4994_v0  ;;  %1099 = vmatprep.mubr.f32.mxu1 %v4994_v0 }
  0x47   : > { %3995 = vmatprep.subr.msk.mxu0 %vm522_vm1, %v618_v6 }
  0x49   : > { %3985 = vmatmul.mubr.msk.f32.vlgmr.msra.gmra.mrb[4].mxu0 %vm509_vm2, %v5138_v13  ;;  %4005 = vmatmul.mubr.msk.f32.gmra.mrb[20].mxu1 %vm509_vm2, %v5189_v31 }
  0x4a   : > { %826 = vmatprep.mubr.f32.mxu0 %v4994_v0  ;;  %1105 = vmatprep.mubr.f32.mxu1 %v4994_v0 }
  0x4b   : > { %3996 = vmatpush1.msk.msra.mxu0 %vm522_vm1, %v5176_v28  ;;  %v1392_v28 = vrot.slane %v1388_v22, %v5393_v21 }
  0x4c   : > { %4007 = vmatprep.subr.msk.mxu0 %vm522_vm1, %v620_v8 }
  0x4d   : > { %3986 = vmatmul.mubr.msk.f32.gmra.mrb[6].mxu0 %vm509_vm2, %v5164_v23  ;;  %4006 = vmatmul.mubr.msk.f32.gmra.mrb[22].mxu1 %vm509_vm2, %v5205_v37  ;;  %vm5417_vm0 = vcmp.eq.s32.totalorder %v1392_v28, 1 }
  0x4e   : > { %832 = vmatprep.mubr.f32.mxu0 %v4994_v0  ;;  %1265 = vmatprep.mubr.f32.mxu1 %v4994_v0 }
  0x51   : > { %3987 = vmatmul.mubr.msk.f32.gmra.mrb[8].mxu0 %vm509_vm2, %v5189_v31  ;;  %4015 = vmatmul.mubr.msk.f32.vlgmr.msra.gmra.mrb[24].mxu1 %vm509_vm2, %v5138_v13 }
  0x52   : > { %838 = vmatprep.mubr.f32.mxu0 %v4994_v0  ;;  %1271 = vmatprep.mubr.f32.mxu1 %v4994_v0 }
  0x55   : > { %3988 = vmatmul.mubr.msk.f32.gmra.mrb[10].mxu0 %vm509_vm2, %v5205_v37  ;;  %4016 = vmatmul.mubr.msk.f32.gmra.mrb[26].mxu1 %vm509_vm2, %v5164_v23 }
  0x56   : > { %998 = vmatprep.mubr.f32.mxu0 %v4994_v0  ;;  %1277 = vmatprep.mubr.f32.mxu1 %v4994_v0 }
  0x59   : > { %3997 = vmatmul.mubr.msk.f32.vlgmr.msra.gmra.mrb[12].mxu0 %vm509_vm2, %v5138_v13  ;;  %4017 = vmatmul.mubr.msk.f32.gmra.mrb[28].mxu1 %vm509_vm2, %v5189_v31 }
  0x5a   : > { %1004 = vmatprep.mubr.f32.mxu0 %v4994_v0  ;;  %1283 = vmatprep.mubr.f32.mxu1 %v4994_v0 }
  0x5b   : > { %4008 = vmatpush1.msk.msra.mxu0 %vm522_vm1, %v5211_v41  ;;  %v5433_v41 = vsel %vm1538_vm11, 1, %v4995_v2 }
  0x5c   : > { %4019 = vmatprep.subr.msk.mxu0 %vm522_vm1, %v622_v7 }
  0x5d   : > { %3998 = vmatmul.mubr.msk.f32.gmra.mrb[14].mxu0 %vm509_vm2, %v5164_v23  ;;  %4018 = vmatmul.mubr.msk.f32.gmra.mrb[30].mxu1 %vm509_vm2, %v5205_v37 }
  0x5e   : > { %1010 = vmatprep.mubr.f32.mxu0 %v4994_v0 }
  0x61   : > { %3999 = vmatmul.mubr.msk.f32.gmra.mrb[16].mxu0 %vm509_vm2, %v5189_v31 }
  0x62   : > { %1016 = vmatprep.mubr.f32.mxu0 %v4994_v0 }
  0x65   : > { %4000 = vmatmul.mubr.msk.f32.gmra.mrb[18].mxu0 %vm509_vm2, %v5205_v37 }
  0x66   : > { %1176 = vmatprep.mubr.f32.mxu0 %v4994_v0 }
  0x69   : > { %4009 = vmatmul.mubr.msk.f32.vlgmr.msra.gmra.mrb[20].mxu0 %vm509_vm2, %v5138_v13 }
  0x6a   : > { %1182 = vmatprep.mubr.f32.mxu0 %v4994_v0  ;;  %4020 = vmatpush1.msk.msra.mxu0 %vm522_vm1, %v5236_v55  ;;  %v1732_v55 = vrot.slane %v5438_v43, %v5393_v21 }
  0x6c   : > { %vm5609_vm11 = vcmp.eq.s32.totalorder %v1732_v55, 1 }
  0x6d   : > { %4010 = vmatmul.mubr.msk.f32.gmra.mrb[22].mxu0 %vm509_vm2, %v5164_v23 }
  0x6e   : > { %1188 = vmatprep.mubr.f32.mxu0 %v4994_v0 }
  0x71   : > { %4011 = vmatmul.mubr.msk.f32.gmra.mrb[24].mxu0 %vm509_vm2, %v5189_v31 }
  0x72   : > { %1194 = vmatprep.mubr.f32.mxu0 %v4994_v0 }
  0x75   : > { %4012 = vmatmul.mubr.msk.f32.gmra.mrb[26].mxu0 %vm509_vm2, %v5205_v37 }
  0x76   : > { %1354 = vmatprep.mubr.f32.mxu0 %v4994_v0 }
  0x79   : > { %4021 = vmatmul.mubr.msk.f32.vlgmr.msra.gmra.mrb[28].mxu0 %vm509_vm2, %v5138_v13 }
  0x7a   : > { %1360 = vmatprep.mubr.f32.mxu0 %v4994_v0 }
  0x7d   : > { %4022 = vmatmul.mubr.msk.f32.gmra.mrb[30].mxu0 %vm509_vm2, %v5164_v23  ;;  %v1431_v23 = vsel %vm1430_vm5, 1, %v4995_v2  ;;  %vm1781_vm5 = vcmp.gt.f32.partialorder %v5130_v11, 14.0 }
  0x7e   : > { %1366 = vmatprep.mubr.f32.mxu0 %v4994_v0  ;;  %v1435_v29 = vrot.slane %v1431_v23, %v5393_v21  ;;  %v5492_v63 = vsel %vm1781_vm5, 1, %v4995_v2 }
  0x80   : > { %vm5421_vm1 = vcmp.eq.s32.totalorder %v1435_v29, 1 }
  0x81   : > { %4023 = vmatmul.mubr.msk.f32.gmra.mrb[32].mxu0 %vm509_vm2, %v5189_v31  ;;  %v1624_v31 = vrot.slane %v1620_v26, %v5393_v21 }
  0x82   : > { %1372 = vmatprep.mubr.f32.mxu0 %v4994_v0  ;;  %v1831_v0 = vld [vmem:[%s6950_s7] sm:$0xff] }
  0x83   : > { %4403 = vmatprep.mubr.msk.f32.mxu1 %vm1887_vm3, %v1831_v0  ;;  %vm5465_vm8 = vcmp.eq.s32.totalorder %v1624_v31, 1 }
  0x85   : > { %4024 = vmatmul.mubr.msk.f32.gmra.mrb[34].mxu0 %vm509_vm2, %v5205_v37  ;;  %vm1673_vm2 = vcmp.gt.f32.partialorder %v5130_v11, 10.0  ;;  %v1759_v11 = vrot.slane %v5441_v44, %v5393_v21  ;;  %v5775_v37 = vld [vmem:[%s6949_s6 + $0x10] sm:$0xff] }
  0x86   : > { %4423 = vmatprep.mubr.msk.f32.mxu0 %vm1887_vm3, %v5360_v9  ;;  %v5454_v49 = vsel %vm1673_vm2, 1, %v4995_v2 }
  0x87   : > { %vm5628_vm12 = vcmp.eq.s32.totalorder %v1759_v11, 1 }
  0x98   : > { %v5449_v47 = vpop.permute.xlu0 %1400 }
  0x9c   : > { %v5521_v25 = vpop.permute.xlu0 %1405 }
  0xf4   : > { %v5364_v10 = vpop.f32.mrb[0].mxu1 }
  0xf5   : > { %v5366_v12 = vpop.f32.mrb[1].mxu1 }
  0xf8   : > { %v5368_v13 = vpop.f32.mrb[2].mxu1 }
  0xf9   : > { %v5373_v14 = vpop.f32.mrb[3].mxu1 }
  0xfc   : > { %v5376_v15 = vpop.f32.mrb[4].mxu1 }
  0xfd   : > { %v5378_v16 = vpop.f32.mrb[5].mxu1 }
 0x100   : > { %v5380_v17 = vpop.f32.mrb[6].mxu1 }
 0x101   : > { %v5382_v18 = vpop.f32.mrb[7].mxu1 }
 0x104   : > { %v5384_v19 = vpop.f32.mrb[8].mxu1 }
 0x105   : > { %v5388_v20 = vpop.f32.mrb[9].mxu1 }
 0x108   : > { %v917_v24 = vpop.f32.mrb[10].mxu1 }
 0x109   : > { %v919_v27 = vpop.f32.mrb[11].mxu1 }
 0x10c   : > { %v5405_v32 = vpop.f32.mrb[12].mxu1 }
 0x10d   : > { %v5411_v35 = vpop.f32.mrb[13].mxu1 }
 0x110   : > { %v5435_v42 = vpop.f32.mrb[14].mxu1 }
 0x111   : > { %v5451_v48 = vpop.f32.mrb[15].mxu1 }
 0x114   : > { %v5481_v58 = vpop.f32.mrb[0].mxu0  ;;  %v1089_v59 = vpop.f32.mrb[16].mxu1 }
 0x115   : > { %v5497_v3 = vpop.f32.mrb[1].mxu0  ;;  %v1091_v4 = vpop.f32.mrb[17].mxu1  ;;  %v1384_v6 = vadd.f32 %v5481_v58, %v5368_v13  ;;  %v1427_v8 = vadd.f32 %v5481_v58, %v5373_v14  ;;  %v5508_v7 = vadd.f32 %v5481_v58, %v917_v24  ;;  %v5511_v0 = vadd.f32 %v5481_v58, %v919_v27 }
 0x116   : > { %v1642_v2 = vadd.f32 %v1091_v4, %v5497_v3  ;;  %v5515_v22 = vadd.f32 %v1089_v59, %v5497_v3  ;;  %v1383_v23 = vadd.f32 %v5364_v10, %v5497_v3  ;;  %v1426_v13 = vadd.f32 %v5366_v12, %v5497_v3 }
 0x117   : > { %v1395_v14 = vsel %vm5417_vm0, %v1384_v6, 0.0  ;;  %v1438_v24 = vsel %vm5421_vm1, %v1427_v8, 0.0  ;;  %v5529_v26 = vadd.f32 %v5384_v19, %v5497_v3  ;;  %v5533_v27 = vadd.f32 %v5388_v20, %v5497_v3 }
 0x118   : > { %v1653_v10 = vsel %vm5461_vm7, %v1642_v2, 0.0  ;;  %v5537_v12 = vpop.f32.mrb[2].mxu0  ;;  %v1095_v28 = vpop.f32.mrb[18].mxu1  ;;  %v1394_v29 = vsel %vm5417_vm0, %v1383_v23, 0.0  ;;  %v1437_v30 = vsel %vm5421_vm1, %v1426_v13, 0.0  ;;  %v1419_v4 = vadd.f32 %v5521_v25, %v1395_v14 }
 0x119   : > { %v5546_v31 = vadd.f32 %v1653_v10, %v5449_v47  ;;  %v1616_v20 = vadd.f32 %v5481_v58, %v1095_v28  ;;  %v5549_v33 = vpop.f32.mrb[3].mxu0  ;;  %v1097_v34 = vpop.f32.mrb[19].mxu1  ;;  %v1418_v38 = vadd.f32 %v5449_v47, %v1394_v29  ;;  %v5553_v39 = vadd.f32 %v1437_v30, %v5449_v47 }
 0x11a   : > { %v1643_v59 = vadd.f32 %v5481_v58, %v1097_v34  ;;  %v5558_v6 = vadd.f32 %v1438_v24, %v5521_v25  ;;  %v5562_v8 = vadd.f32 %v5376_v15, %v5549_v33  ;;  %v5564_v2 = vpop.permute.xlu1 %1410  ;;  %v1423_v30 = vmax.f32 %v1419_v4, 0.0 }
 0x11b   : > { %7024 = vst [vmem:[#allocation7_spill] sm:$0xff] %v5546_v31  ;;  %7025 = vst [vmem:[#allocation8_spill] sm:$0xff] %v5553_v39  ;;  %v1627_v23 = vsel %vm5465_vm8, %v1616_v20, 0.0  ;;  %v1422_v13 = vmax.f32 %v1418_v38, 0.0  ;;  %v6953_v10 = vmax.f32 %v5553_v39, 0.0  ;;  %v1428_v39 = vadd.f32 %v5378_v16, %v5549_v33 }
 0x11c   : > { %7026 = vst [vmem:[#allocation9_spill] sm:$0xff] %v5558_v6  ;;  %v1654_v24 = vsel %vm5461_vm7, %v1643_v59, 0.0  ;;  %v822_v15 = vpop.f32.mrb[4].mxu0  ;;  %v1101_v29 = vpop.f32.mrb[20].mxu1  ;;  %v6954_v34 = vmax.f32 %v5558_v6, 0.0  ;;  %v5578_v20 = vadd.f32 %v1627_v23, %v5521_v25  ;;  %v7042_v16 = vrot.slane %v5433_v41, %v5393_v21 }
 0x11d   : > { %v1449_v38 = vmax.f32 %v1422_v13, %v6953_v10  ;;  %v1453_v28 = vadd.f32 %v822_v15, %v5497_v3  ;;  %v1617_v19 = vadd.f32 %v1101_v29, %v5549_v33  ;;  %v824_v62 = vpop.f32.mrb[5].mxu0  ;;  %v1103_v14 = vpop.f32.mrb[21].mxu1  ;;  %v4743_v57 = vpack.c.bf16 %v1423_v30, %v1422_v13 }
 0x11e   : > { %v1480_v59 = vadd.f32 %v824_v62, %v5497_v3  ;;  %v1644_v4 = vadd.f32 %v1103_v14, %v5549_v33  ;;  %v5588_v56 = vadd.f32 %v1654_v24, %v5521_v25  ;;  %v1450_v29 = vmax.f32 %v1423_v30, %v6954_v34 }
 0x11f   : > { %v1464_v23 = vsel %vm5483_vm9, %v1453_v28, 0.0  ;;  %v1628_v15 = vsel %vm5465_vm8, %v1617_v19, 0.0  ;;  %4744 = vmatprep.subr.bf16.mxu0 %v4743_v57  ;;  %vm5692_vm14 = vcmp.eq.s32.totalorder %v7042_v16, 1 }
 0x120   : > { %7027 = vst [vmem:[#allocation10_spill] sm:$0xff] %v5588_v56  ;;  %v5597_v10 = vadd.f32 %v1464_v23, %v5449_v47  ;;  %v5600_v62 = vadd.f32 %v1628_v15, %v5564_v2  ;;  %v1491_v13 = vsel %vm5499_vm10, %v1480_v59, 0.0  ;;  %v1655_v14 = vsel %vm5461_vm7, %v1644_v4, 0.0  ;;  %v828_v28 = vpop.f32.mrb[6].mxu0  ;;  %v1107_v24 = vpop.f32.mrb[22].mxu1  ;;  %4746 = vmatpush3.bf16.msra.mxu0 %v4743_v57 }
 0x121   : > { %v5615_v23 = vadd.f32 %v1491_v13, %v5449_v47  ;;  %v1454_v59 = vadd.f32 %v5481_v58, %v828_v28  ;;  %v1618_v15 = vadd.f32 %v5537_v12, %v1107_v24  ;;  %v830_v4 = vpop.f32.mrb[7].mxu0  ;;  %v1109_v34 = vpop.f32.mrb[23].mxu1  ;;  %v5621_v43 = vadd.f32 %v1655_v14, %v5564_v2 }
 0x122   : > { %7028 = vst [vmem:[#allocation11_spill] sm:$0xff] %v5600_v62  ;;  %v6955_v61 = vmax.f32 %v5597_v10, 0.0  ;;  %v1481_v55 = vadd.f32 %v5481_v58, %v830_v4  ;;  %v1645_v54 = vadd.f32 %v5537_v12, %v1109_v34  ;;  %v5633_v28 = vpop.permute.xlu1 %1415 }
 0x123   : > { %7031 = vst [vmem:[#allocation12_spill] sm:$0xff] %v5615_v23  ;;  %7032 = vst [vmem:[#allocation13_spill] sm:$0xff] %v5621_v43  ;;  %v1465_v14 = vsel %vm5483_vm9, %v1454_v59, 0.0  ;;  %v1629_v4 = vsel %vm5465_vm8, %v1618_v15, 0.0  ;;  %v1386_v15 = vadd.f32 %v5537_v12, %v5380_v17 }
 0x124   : > { %v1476_v34 = vmax.f32 %v1449_v38, %v6955_v61  ;;  %v5644_v11 = vadd.f32 %v1465_v14, %v5521_v25  ;;  %v1492_v57 = vsel %vm5499_vm10, %v1481_v55, 0.0  ;;  %v834_v30 = vpop.f32.mrb[8].mxu0  ;;  %v1267_v53 = vpop.f32.mrb[24].mxu1  ;;  %v1656_v59 = vsel %vm5461_vm7, %v1645_v54, 0.0 }
 0x125   : > { %v5649_v24 = vadd.f32 %v1492_v57, %v5521_v25  ;;  %v1396_v38 = vsel %vm5417_vm0, %v5562_v8, 0.0  ;;  %v836_v14 = vpop.f32.mrb[9].mxu0  ;;  %v1269_v44 = vpop.f32.mrb[25].mxu1  ;;  %v7036_v61 = vmax.f32 %v5615_v23, 0.0  ;;  %v5665_v51 = vadd.f32 %v1629_v4, %v5633_v28 }
 0x126   : > { %v6959_v57 = vmax.f32 %v5644_v11, 0.0  ;;  %v1397_v17 = vsel %vm5417_vm0, %v1386_v15, 0.0  ;;  %v1420_v8 = vadd.f32 %v5564_v2, %v1396_v38  ;;  %v1455_v4 = vadd.f32 %v834_v30, %v5549_v33 }
 0x127   : > { %7035 = vst [vmem:[#allocation14_spill] sm:$0xff] %v5649_v24  ;;  %v5660_v55 = vmax.f32 %v1476_v34, %v7036_v61  ;;  %7037 = vst [vmem:[#allocation15_spill] sm:$0xff] %v5665_v51  ;;  %v5676_v34 = vadd.f32 %v1656_v59, %v5633_v28  ;;  %v5679_v6 = vadd.f32 %v5633_v28, %v1397_v17  ;;  %v1439_v30 = vsel %vm5421_vm1, %v1428_v39, 0.0 }
 0x128   : > { %v1477_v61 = vmax.f32 %v1450_v29, %v6959_v57  ;;  %v840_v54 = vpop.f32.mrb[10].mxu0  ;;  %v1273_v23 = vpop.f32.mrb[26].mxu1  ;;  %v1424_v59 = vmax.f32 %v1420_v8, 0.0  ;;  %v1723_v38 = vadd.f32 %v1267_v53, %v5497_v3  ;;  %v1482_v17 = vadd.f32 %v836_v14, %v5549_v33 }
 0x129   : > { %7038 = vst [vmem:[#allocation16_spill] sm:$0xff] %v5676_v34  ;;  %v842_v40 = vpop.f32.mrb[11].mxu0  ;;  %v1275_v36 = vpop.f32.mrb[27].mxu1  ;;  %v7045_v57 = vmax.f32 %v5649_v24, 0.0  ;;  %v1425_v41 = vmax.f32 %v5679_v6, 0.0  ;;  %v5706_v16 = vadd.f32 %v1439_v30, %v5564_v2  ;;  %v1466_v8 = vsel %vm5483_vm9, %v1455_v4, 0.0 }
 0x12a   : > { %v5711_v39 = vadd.f32 %v1466_v8, %v5564_v2  ;;  %v1734_v53 = vsel %vm5609_vm11, %v1723_v38, 0.0  ;;  %v1493_v14 = vsel %vm5499_vm10, %v1482_v17, 0.0  ;;  %v7048_v8 = vrot.slane %v5444_v45, %v5393_v21 }
 0x12b   : > { %v5702_v1 = vmax.f32 %v1477_v61, %v7045_v57  ;;  %7046 = vst [vmem:[#allocation17_spill] sm:$0xff] %v5706_v16  ;;  %v1750_v57 = vadd.f32 %v1269_v44, %v5497_v3  ;;  %v4747_v6 = vpack.c.bf16 %v1425_v41, %v1424_v59  ;;  %v5721_v24 = vadd.f32 %v1493_v14, %v5564_v2 }
 0x12c   : > { %v1000_v4 = vpop.f32.mrb[12].mxu0  ;;  %vm5726_vm15 = vcmp.eq.s32.totalorder %v7048_v8, 1  ;;  %v1279_v38 = vpop.f32.mrb[28].mxu1  ;;  %v1429_v61 = vadd.f32 %v5537_v12, %v5382_v18  ;;  %v1456_v14 = vadd.f32 %v5537_v12, %v840_v54  ;;  %v7051_v45 = vmax.f32 %v5706_v16, 0.0  ;;  %v5753_v54 = vld [vmem:[%s6949_s6 + $0x8] sm:$0xff] }
 0x12d   : > { %7047 = vst [vmem:[#allocation18_spill] sm:$0xff] %v5721_v24  ;;  %v1761_v44 = vsel %vm5628_vm12, %v1750_v57, 0.0  ;;  %v1002_v30 = vpop.f32.mrb[13].mxu0  ;;  %v1281_v51 = vpop.f32.mrb[29].mxu1  ;;  %4748 = vmatprep.subr.bf16.mxu0 %v4747_v6  ;;  %v5740_v56 = vadd.f32 %v1734_v53, %v5449_v47  ;;  %v7053_v57 = vrot.slane %v5447_v46, %v5393_v21  ;;  %v1483_v46 = vadd.f32 %v5537_v12, %v842_v40 }
 0x12e   : > { %v1451_v8 = vmax.f32 %v1424_v59, %v7051_v45  ;;  %4750 = vmatpush3.bf16.msra.mxu0 %v4747_v6  ;;  %v1440_v59 = vsel %vm5421_vm1, %v1429_v61, 0.0  ;;  %v1467_v53 = vsel %vm5483_vm9, %v1456_v14, 0.0  ;;  %v1724_v45 = vadd.f32 %v5481_v58, %v1273_v23 }
 0x12f   : > { %7052 = vst [vmem:[#allocation19_spill] sm:$0xff] %v5740_v56  ;;  %vm5746_vm0 = vcmp.eq.s32.totalorder %v7053_v57, 1  ;;  %v7056_v57 = vmax.f32 %v5711_v39, 0.0  ;;  %v5764_v6 = vadd.f32 %v1761_v44, %v5449_v47  ;;  %v5767_v17 = vadd.f32 %v1440_v59, %v5633_v28 }
 0x130   : > { %v5770_v16 = vadd.f32 %v1467_v53, %v5633_v28  ;;  %v1006_v60 = vpop.f32.mrb[14].mxu0  ;;  %v5777_v23 = vpop.f32.mrb[30].mxu1  ;;  %v1735_v40 = vsel %vm5609_vm11, %v1724_v45, 0.0  ;;  %v1494_v61 = vsel %vm5499_vm10, %v1483_v46, 0.0  ;;  %v1751_v44 = vadd.f32 %v5481_v58, %v1275_v36 }
 0x131   : > { %v1478_v31 = vmax.f32 %v1451_v8, %v7056_v57  ;;  %7057 = vst [vmem:[#allocation20_spill] sm:$0xff] %v5764_v6  ;;  %7058 = vst [vmem:[#allocation21_spill] sm:$0xff] %v5767_v17  ;;  %v7059_v14 = vmax.f32 %v5597_v10, 0.0  ;;  %v7060_v8 = vmax.f32 %v5644_v11, 0.0  ;;  %v1008_v53 = vpop.f32.mrb[15].mxu0  ;;  %v5788_v57 = vpop.f32.mrb[31].mxu1  ;;  %4424 = vmatmul.mubr.msk.f32.vlgmr.msra.gmra.mrb[36].mxu0 %vm1887_vm3, %v5753_v54  ;;  %v5799_v36 = vadd.f32 %v1735_v40, %v5521_v25 }
 0x132   : > { %v7061_v34 = vmax.f32 %v5721_v24, 0.0  ;;  %v6975_v5 = vmax.f32 %v5767_v17, 0.0  ;;  %v6978_v45 = vmax.f32 %v5770_v16, 0.0  ;;  %v5802_v10 = vadd.f32 %v1494_v61, %v5633_v28  ;;  %4426 = vmatprep.mubr.msk.f32.mxu0 %vm1887_vm3, %v5775_v37 }
 0x133   : > { %v4759_v59 = vpack.c.bf16 %v7060_v8, %v7059_v14  ;;  %7062 = vst [vmem:[#allocation22_spill] sm:$0xff] %v5799_v36  ;;  %v1762_v11 = vsel %vm5628_vm12, %v1751_v44, 0.0  ;;  %v1545_v46 = vsel %vm5692_vm14, %v5533_v27, 0.0  ;;  %v1588_v27 = vadd.f32 %v1002_v30, %v5497_v3 }
 0x134   : > { %v5792_v62 = vmax.f32 %v1478_v31, %v7061_v34  ;;  %7063 = vst [vmem:[#allocation23_spill] sm:$0xff] %v5802_v10  ;;  %v5811_v31 = vld [vmem:[%s6949_s6 + $0x18] sm:$0xff]  ;;  %v1518_v34 = vsel %vm5685_vm13, %v5529_v26, 0.0  ;;  %v1452_v61 = vmax.f32 %v1425_v41, %v6975_v5  ;;  %v5823_v44 = vadd.f32 %v1762_v11, %v5521_v25  ;;  %v5831_v26 = vld [vmem:[%s6949_s6 + $0x20] sm:$0xff]  ;;  %v5833_v8 = vpop.f32.mrb[16].mxu0 }
 0x135   : > { %4760 = vmatprep.subr.bf16.mxu0 %v4759_v59  ;;  %v5826_v14 = vadd.f32 %v1518_v34, %v5449_v47  ;;  %v5837_v40 = vadd.f32 %v1545_v46, %v5449_v47  ;;  %v1561_v41 = vadd.f32 %v1000_v4, %v5497_v3  ;;  %v1725_v11 = vadd.f32 %v1279_v38, %v5549_v33 }
 0x136   : > { %7064 = vst [vmem:[#allocation24_spill] sm:$0xff] %v5823_v44  ;;  %4762 = vmatpush3.bf16.msra.mxu0 %v4759_v59  ;;  %v5841_v59 = vpop.f32.mrb[17].mxu0  ;;  %v1479_v5 = vmax.f32 %v1452_v61, %v6978_v45  ;;  %v1752_v17 = vadd.f32 %v1281_v51, %v5549_v33  ;;  %v5860_v61 = vld [vmem:[%s6949_s6 + $0x28] sm:$0xff]  ;;  %v7066_v34 = vmax.f32 %v5802_v10, 0.0  ;;  %v5877_v45 = vld [vmem:[%s6949_s6 + $0x30] sm:$0xff] }
 0x137   : > { %7065 = vst [vmem:[#allocation25_spill] sm:$0xff] %v5837_v40  ;;  %4427 = vmatmul.mubr.msk.f32.gmra.mrb[38].mxu0 %vm1887_vm3, %v5811_v31  ;;  %v6979_v24 = vmax.f32 %v5826_v14, 0.0  ;;  %v1572_v38 = vsel %vm5726_vm15, %v1561_v41, 0.0  ;;  %v1736_v51 = vsel %vm5609_vm11, %v1725_v11, 0.0  ;;  %7067 = vst [vmem:[#allocation26_spill] sm:$0xff] %v5877_v45  ;;  %v1546_v11 = vsel %vm5692_vm14, %v5511_v0, 0.0 }
 0x138   : > { %4429 = vmatprep.mubr.msk.f32.mxu0 %vm1887_vm3, %v5831_v26  ;;  %v5864_v30 = vmax.f32 %v1479_v5, %v7066_v34  ;;  %v5870_v41 = vadd.f32 %v1572_v38, %v5449_v47  ;;  %v5879_v4 = vpop.f32.mrb[18].mxu0  ;;  %v1599_v34 = vsel %vm5746_vm0, %v1588_v27, 0.0  ;;  %v1763_v27 = vsel %vm5628_vm12, %v1752_v17, 0.0  ;;  %v5915_v17 = vld [vmem:[%s6949_s6 + $0x38] sm:$0xff] }
 0x139   : > { %v1530_v46 = vmax.f32 %v5660_v55, %v6979_v24  ;;  %v1519_v55 = vsel %vm5685_vm13, %v5508_v7, 0.0  ;;  %v5890_v38 = vpop.f32.mrb[19].mxu0  ;;  %v7068_v24 = vmax.f32 %v5837_v40, 0.0  ;;  %v5896_v5 = vadd.f32 %v1599_v34, %v5449_v47 }
 0x13a   : > { %v6993_v36 = vmax.f32 %v5870_v41, 0.0  ;;  %v5903_v7 = vadd.f32 %v1736_v51, %v5564_v2  ;;  %v1523_v0 = vadd.f32 %v1519_v55, %v5521_v25  ;;  %v5907_v44 = vadd.f32 %v1546_v11, %v5521_v25 }
 0x13b   : > { %v1557_v10 = vmax.f32 %v1530_v46, %v7068_v24  ;;  %4430 = vmatmul.mubr.msk.f32.gmra.mrb[40].mxu0 %vm1887_vm3, %v5860_v61  ;;  %v1562_v24 = vadd.f32 %v5481_v58, %v1006_v60  ;;  %v6992_v51 = vmax.f32 %v5896_v5, 0.0  ;;  %v1726_v34 = vadd.f32 %v5537_v12, %v5777_v23 }
 0x13c   : > { %4432 = vmatprep.mubr.msk.f32.mxu0 %vm1887_vm3, %v5877_v45  ;;  %v1589_v55 = vadd.f32 %v5481_v58, %v1008_v53  ;;  %v5923_v11 = vpop.f32.mrb[20].mxu0  ;;  %v5926_v60 = vadd.f32 %v1763_v27, %v5564_v2  ;;  %v1527_v40 = vmax.f32 %v1523_v0, 0.0  ;;  %v6994_v6 = vmax.f32 %v5907_v44, 0.0 }
 0x13d   : > { %v1584_v46 = vmax.f32 %v1557_v10, %v6993_v36  ;;  %v1573_v56 = vsel %vm5726_vm15, %v1562_v24, 0.0  ;;  %v5931_v45 = vpop.f32.mrb[21].mxu0  ;;  %v1737_v53 = vsel %vm5609_vm11, %v1726_v34, 0.0  ;;  %v7070_v34 = vmax.f32 %v5711_v39, 0.0 }
 0x13e   : > { %v5938_v23 = vadd.f32 %v1573_v56, %v5521_v25  ;;  %v1600_v27 = vsel %vm5746_vm0, %v1589_v55, 0.0  ;;  %v1531_v0 = vmax.f32 %v5702_v1, %v1527_v40  ;;  %v5948_v24 = vadd.f32 %v1737_v53, %v5633_v28 }
 0x13f   : > { %v5935_v10 = vmax.f32 %v1584_v46, %v6992_v51  ;;  %4433 = vmatmul.mubr.msk.f32.gmra.mrb[42].mxu0 %vm1887_vm3, %v5915_v17  ;;  %v5951_v46 = vadd.f32 %v1600_v27, %v5521_v25  ;;  %v5955_v56 = vadd.f32 %v5537_v12, %v5788_v57  ;;  %v7071_v55 = vmax.f32 %v5770_v16, 0.0 }
 0x140   : > { %4463 = vmatprep.mubr.msk.f32.mxu0 %vm1887_vm3, %v5360_v9  ;;  %v1509_v53 = vadd.f32 %v5405_v32, %v5549_v33  ;;  %v1536_v27 = vadd.f32 %v5411_v35, %v5549_v33  ;;  %v5968_v51 = vpop.f32.mrb[22].mxu0  ;;  %v1558_v19 = vmax.f32 %v1531_v0, %v6994_v6  ;;  %v7072_v16 = vrot.slane %v5454_v49, %v5393_v21 }
 0x141   : > { %7069 = vst [vmem:[#allocation27_spill] sm:$0xff] %v5951_v46  ;;  %v4763_v1 = vpack.c.bf16 %v7071_v55, %v7070_v34  ;;  %v5982_v32 = vpop.f32.mrb[23].mxu0  ;;  %v1563_v6 = vadd.f32 %v5833_v8, %v5549_v33  ;;  %v7075_v49 = vmax.f32 %v5938_v23, 0.0  ;;  %v7076_v35 = vmax.f32 %v5826_v14, 0.0 }
 0x142   : > { %vm5978_vm1 = vcmp.eq.s32.totalorder %v7072_v16, 1  ;;  %v1520_v55 = vsel %vm5685_vm13, %v1509_v53, 0.0  ;;  %v1547_v0 = vsel %vm5692_vm14, %v1536_v27, 0.0  ;;  %v1764_v53 = vsel %vm5628_vm12, %v5955_v56, 0.0 }
 0x143   : > { %4764 = vmatprep.subr.bf16.mxu0 %v4763_v1  ;;  %v1585_v16 = vmax.f32 %v1558_v19, %v7075_v49  ;;  %v1524_v36 = vadd.f32 %v1520_v55, %v5564_v2  ;;  %v5995_v57 = vadd.f32 %v1547_v0, %v5564_v2  ;;  %v4775_v39 = vpack.c.bf16 %v1527_v40, %v7076_v35 }
 0x144   : > { %4766 = vmatpush3.bf16.msra.mxu0 %v4763_v1  ;;  %v1574_v27 = vsel %vm5726_vm15, %v1563_v6, 0.0  ;;  %v1590_v8 = vadd.f32 %v5841_v59, %v5549_v33  ;;  %v1510_v19 = vadd.f32 %v5537_v12, %v5435_v42  ;;  %v6008_v1 = vpop.f32.mrb[24].mxu0  ;;  %v7077_v55 = vmax.f32 %v5951_v46, 0.0 }
 0x145   : > { %v1528_v14 = vmax.f32 %v1524_v36, 0.0  ;;  %v6997_v40 = vmax.f32 %v5995_v57, 0.0  ;;  %v6014_v13 = vadd.f32 %v1574_v27, %v5564_v2  ;;  %4776 = vmatprep.subr.bf16.mxu0 %v4775_v39  ;;  %v7078_v6 = vrot.slane %v5457_v50, %v5393_v21  ;;  %v6023_v42 = vpop.f32.mrb[25].mxu0 }
 0x146   : > { %v1612_v0 = vmax.f32 %v1585_v16, %v7077_v55  ;;  %v1601_v56 = vsel %vm5746_vm0, %v1590_v8, 0.0  ;;  %v1521_v36 = vsel %vm5685_vm13, %v1510_v19, 0.0  ;;  %v1537_v35 = vadd.f32 %v5537_v12, %v5451_v48 }
 0x147   : > { %vm6019_vm2 = vcmp.eq.s32.totalorder %v7078_v6, 1  ;;  %4464 = vmatmul.mubr.msk.f32.vlgmr.msra.gmra.mrb[44].mxu0 %vm1887_vm3, %v5753_v54  ;;  %v1564_v50 = vadd.f32 %v5537_v12, %v5879_v4  ;;  %v7081_v49 = vmax.f32 %v5578_v20, 0.0  ;;  %v1532_v27 = vmax.f32 %v5792_v62, %v1528_v14 }
 0x148   : > { %v6999_v55 = vmax.f32 %v6014_v13, 0.0  ;;  %v6040_v8 = vadd.f32 %v1601_v56, %v5564_v2  ;;  %4778 = vmatpush3.bf16.msra.mxu0 %v4775_v39  ;;  %4466 = vmatprep.mubr.msk.f32.mxu0 %vm1887_vm3, %v5775_v37  ;;  %v1525_v15 = vadd.f32 %v1521_v36, %v5633_v28  ;;  %v1548_v48 = vsel %vm5692_vm14, %v1537_v35, 0.0  ;;  %v6051_v19 = vpop.f32.mrb[26].mxu0 }
 0x149   : > { %v1639_v16 = vmax.f32 %v1612_v0, %v7081_v49  ;;  %v1575_v4 = vsel %vm5726_vm15, %v1564_v50, 0.0  ;;  %v1591_v62 = vadd.f32 %v5537_v12, %v5890_v38  ;;  %v1559_v0 = vmax.f32 %v1532_v27, %v6997_v40  ;;  %v6062_v29 = vpop.f32.mrb[27].mxu0  ;;  %v7094_v40 = vld [vmem:[#allocation26_spill] sm:$0xff] }
 0x14a   : > { %7082 = vst [vmem:[#allocation28_spill] sm:$0xff] %v6040_v8  ;;  %v6995_v39 = vmax.f32 %v6040_v8, 0.0  ;;  %v6057_v6 = vadd.f32 %v1548_v48, %v5633_v28  ;;  %v6060_v56 = vadd.f32 %v1575_v4, %v5633_v28  ;;  %v1529_v43 = vmax.f32 %v1525_v15, 0.0 }
 0x14b   : > { %v1602_v36 = vsel %vm5746_vm0, %v1591_v62, 0.0  ;;  %4467 = vmatmul.mubr.msk.f32.gmra.mrb[46].mxu0 %vm1887_vm3, %v5811_v31  ;;  %v7083_v38 = vsel %vm5465_vm8, %v5515_v22, 0.0  ;;  %v1669_v50 = vadd.f32 %v5923_v11, %v5497_v3  ;;  %v1586_v49 = vmax.f32 %v1559_v0, %v6999_v55 }
 0x14c   : > { %v6073_v35 = vadd.f32 %v7083_v38, %v5449_v47  ;;  %v6996_v27 = vmax.f32 %v6057_v6, 0.0  ;;  %v1583_v18 = vmax.f32 %v6060_v56, 0.0  ;;  %v6082_v15 = vadd.f32 %v1602_v36, %v5633_v28  ;;  %4469 = vmatprep.mubr.msk.f32.mxu0 %vm1887_vm3, %v5831_v26  ;;  %v1356_v4 = vpop.f32.mrb[28].mxu0 }
 0x14d   : > { %v1533_v52 = vmax.f32 %v5864_v30, %v1529_v43  ;;  %v4779_v22 = vpack.c.bf16 %v1529_v43, %v1528_v14  ;;  %v1680_v11 = vsel %vm5978_vm1, %v1669_v50, 0.0  ;;  %v6091_v62 = vadd.f32 %v1764_v53, %v5633_v28  ;;  %v6102_v43 = vpop.f32.mrb[29].mxu0 }
 0x14e   : > { %7084 = vst [vmem:[#allocation29_spill] sm:$0xff] %v6082_v15  ;;  %v6998_v48 = vmax.f32 %v6073_v35, 0.0  ;;  %v1613_v0 = vmax.f32 %v1586_v49, %v6995_v39  ;;  %v6096_v56 = vadd.f32 %v1680_v11, %v5449_v47  ;;  %v7085_v36 = vmax.f32 %v5870_v41, 0.0 }
 0x14f   : > { %v7086_v30 = vmax.f32 %v5938_v23, 0.0  ;;  %v1560_v38 = vmax.f32 %v1533_v52, %v6996_v27  ;;  %4780 = vmatprep.subr.bf16.mxu0 %v4779_v22  ;;  %v7000_v53 = vmax.f32 %v6082_v15, 0.0  ;;  %v1696_v49 = vadd.f32 %v5931_v45, %v5497_v3  ;;  %4470 = vmatmul.mubr.msk.f32.gmra.mrb[48].mxu0 %vm1887_vm3, %v5860_v61  ;;  %v7090_v52 = vld [vmem:[#allocation11_spill] sm:$0xff] }
 0x150   : > { %v1638_v50 = vmax.f32 %v5935_v10, %v6998_v48  ;;  %v7087_v41 = vrot.slane %v5492_v63, %v5393_v21  ;;  %v7091_v11 = vmax.f32 %v7090_v52, 0.0  ;;  %4782 = vmatpush3.bf16.msra.mxu0 %v4779_v22  ;;  %v7092_v10 = vld [vmem:[#allocation10_spill] sm:$0xff]  ;;  %v1670_v45 = vadd.f32 %v5481_v58, %v5968_v51  ;;  %4472 = vmatprep.mubr.msk.f32.mxu0 %vm1887_vm3, %v7094_v40 }
 0x151   : > { %v4791_v14 = vpack.c.bf16 %v7086_v30, %v7085_v36  ;;  %v7093_v39 = vmax.f32 %v7092_v10, 0.0  ;;  %v1587_v63 = vmax.f32 %v1560_v38, %v1583_v18  ;;  %v1697_v22 = vadd.f32 %v5481_v58, %v5982_v32 }
 0x152   : > { %vm6117_vm4 = vcmp.eq.s32.totalorder %v7087_v41, 1  ;;  %v1640_v36 = vmax.f32 %v1613_v0, %v7091_v11  ;;  %v7095_v41 = vld [vmem:[#allocation7_spill] sm:$0xff]  ;;  %v1707_v0 = vsel %vm6019_vm2, %v1696_v49, 0.0  ;;  %v1362_v11 = vpop.f32.mrb[30].mxu0  ;;  %v1681_v51 = vsel %vm5978_vm1, %v1670_v45, 0.0 }
 0x153   : > { %v1666_v27 = vmax.f32 %v1639_v16, %v7093_v39  ;;  %v7096_v48 = vmax.f32 %v7095_v41, 0.0  ;;  %4792 = vmatprep.subr.bf16.mxu0 %v4791_v14  ;;  %v6137_v16 = vadd.f32 %v1707_v0, %v5449_v47  ;;  %v7098_v39 = vld [vmem:[#allocation13_spill] sm:$0xff]  ;;  %v1614_v49 = vmax.f32 %v1587_v63, %v7000_v53  ;;  %4473 = vmatmul.mubr.msk.f32.gmra.mrb[50].mxu0 %vm1887_vm3, %v5915_v17 }
 0x154   : > { %v7099_v30 = vmax.f32 %v7098_v39, 0.0  ;;  %v7100_v32 = vmax.f32 %v6096_v56, 0.0  ;;  %v6152_v0 = vadd.f32 %v1681_v51, %v5521_v25  ;;  %v1708_v45 = vsel %vm6019_vm2, %v1697_v22, 0.0  ;;  %4503 = vmatprep.mubr.msk.f32.mxu0 %vm1887_vm3, %v5360_v9 }
 0x155   : > { %v1665_v55 = vmax.f32 %v1638_v50, %v7096_v48  ;;  %7097 = vst [vmem:[#allocation11_spill] sm:$0xff] %v6137_v16  ;;  %v1671_v48 = vadd.f32 %v6008_v1, %v5549_v33  ;;  %v6145_v50 = vpop.f32.mrb[31].mxu0  ;;  %v1698_v22 = vadd.f32 %v6023_v42, %v5549_v33  ;;  %v7109_v15 = vmax.f32 %v6014_v13, 0.0 }
 0x156   : > { %v1667_v38 = vmax.f32 %v1640_v36, %v7099_v30  ;;  %v7101_v36 = vld [vmem:[#allocation6_spill] sm:$0xff]  ;;  %v1368_v63 = vpop.f32.mrb[32].mxu0 }
 0x157   : > { %v1692_v10 = vmax.f32 %v1665_v55, %v7100_v32  ;;  %v7102_v1 = vrot.slane %v7101_v36, %v5393_v21  ;;  %v6167_v55 = vadd.f32 %v1708_v45, %v5521_v25  ;;  %v1682_v51 = vsel %vm5978_vm1, %v1671_v48, 0.0  ;;  %v7106_v32 = vld [vmem:[#allocation15_spill] sm:$0xff]  ;;  %4504 = vmatmul.mubr.msk.f32.vlgmr.msra.gmra.mrb[52].mxu0 %vm1887_vm3, %v5753_v54 }
 0x158   : > { %v7107_v21 = vmax.f32 %v7106_v32, 0.0  ;;  %v6179_v53 = vadd.f32 %v1682_v51, %v5564_v2  ;;  %v1672_v45 = vadd.f32 %v5537_v12, %v6051_v19  ;;  %v7108_v48 = vmax.f32 %v6137_v16, 0.0  ;;  %v7112_v16 = vld [vmem:[#allocation19_spill] sm:$0xff]  ;;  %4794 = vmatpush3.bf16.msra.mxu0 %v4791_v14  ;;  %4506 = vmatprep.mubr.msk.f32.mxu0 %vm1887_vm3, %v5775_v37 }
 0x159   : > { %vm6161_vm5 = vcmp.eq.s32.totalorder %v7102_v1, 1  ;;  %7105 = vst [vmem:[#allocation26_spill] sm:$0xff] %v6167_v55  ;;  %v7006_v1 = vmax.f32 %v6152_v0, 0.0  ;;  %v1709_v41 = vsel %vm6019_vm2, %v1698_v22, 0.0  ;;  %v7113_v22 = vmax.f32 %v7112_v16, 0.0 }
 0x15a   : > { %v1641_v36 = vmax.f32 %v1614_v49, %v7107_v21  ;;  %v1719_v39 = vmax.f32 %v1692_v10, %v7108_v48  ;;  %v4795_v49 = vpack.c.bf16 %v1583_v18, %v7109_v15  ;;  %v1370_v21 = vpop.f32.mrb[33].mxu0  ;;  %v7005_v8 = vmax.f32 %v6179_v53, 0.0  ;;  %v7110_v10 = vld [vmem:[#allocation16_spill] sm:$0xff] }
 0x15b   : > { %v1693_v51 = vmax.f32 %v1666_v27, %v7006_v1  ;;  %v6194_v19 = vadd.f32 %v1709_v41, %v5564_v2  ;;  %v7111_v48 = vmax.f32 %v7110_v10, 0.0  ;;  %v1683_v13 = vsel %vm5978_vm1, %v1672_v45, 0.0  ;;  %v1374_v34 = vpop.f32.mrb[34].mxu0  ;;  %v7115_v45 = vld [vmem:[#allocation20_spill] sm:$0xff]  ;;  %4507 = vmatmul.mubr.msk.f32.gmra.mrb[54].mxu0 %vm1887_vm3, %v5811_v31 }
 0x15c   : > { %v1746_v46 = vmax.f32 %v1719_v39, %v7113_v22  ;;  %v1699_v27 = vadd.f32 %v5537_v12, %v6062_v29  ;;  %v1777_v18 = vadd.f32 %v1356_v4, %v5497_v3  ;;  %v7114_v15 = vmax.f32 %v6167_v55, 0.0  ;;  %4796 = vmatprep.subr.bf16.mxu0 %v4795_v49  ;;  %4509 = vmatprep.mubr.msk.f32.mxu0 %vm1887_vm3, %v5831_v26 }
 0x15d   : > { %v1668_v42 = vmax.f32 %v1641_v36, %v7111_v48  ;;  %v1694_v36 = vmax.f32 %v1667_v38, %v7005_v8  ;;  %v6215_v14 = vadd.f32 %v1683_v13, %v5633_v28  ;;  %v7116_v48 = vmax.f32 %v7115_v45, 0.0  ;;  %v1376_v8 = vpop.f32.mrb[35].mxu0  ;;  %v7119_v13 = vld [vmem:[#allocation22_spill] sm:$0xff]  ;;  %4798 = vmatpush3.bf16.msra.mxu0 %v4795_v49  ;;  %v7123_v49 = vld [vmem:[#allocation24_spill] sm:$0xff] }
 0x15e   : > { %v1720_v41 = vmax.f32 %v1693_v51, %v7114_v15  ;;  %v1710_v29 = vsel %vm6019_vm2, %v1699_v27, 0.0  ;;  %v1788_v4 = vsel %vm6117_vm4, %v1777_v18, 0.0  ;;  %v7117_v51 = vmax.f32 %v6073_v35, 0.0 }
 0x15f   : > { %v1773_v22 = vmax.f32 %v1746_v46, %v7116_v48  ;;  %v7118_v38 = vmax.f32 %v5578_v20, 0.0  ;;  %v7120_v1 = vmax.f32 %v7119_v13, 0.0  ;;  %v7121_v55 = vmax.f32 %v6194_v19, 0.0  ;;  %4510 = vmatmul.mubr.msk.f32.gmra.mrb[56].mxu0 %vm1887_vm3, %v5860_v61 }
 0x160   : > { %v1691_v27 = vmax.f32 %v6215_v14, 0.0  ;;  %v6235_v46 = vadd.f32 %v1710_v29, %v5633_v28  ;;  %v1772_v35 = vmax.f32 %v6091_v62, 0.0  ;;  %v6241_v20 = vadd.f32 %v1788_v4, %v5449_v47  ;;  %4512 = vmatprep.mubr.msk.f32.mxu0 %vm1887_vm3, %v7094_v40  ;;  %v1833_v62 = vld [vmem:[%s6950_s7 + $0x10] sm:$0xff] }
 0x161   : > { %v6227_v15 = vpack.c.bf16 %v7118_v38, %v7117_v51  ;;  %v1747_v39 = vmax.f32 %v1720_v41, %v7120_v1  ;;  %v1721_v59 = vmax.f32 %v1694_v36, %v7121_v55  ;;  %v1804_v1 = vadd.f32 %v6102_v43, %v5497_v3 }
 0x162   : > { %v1778_v55 = vadd.f32 %v5481_v58, %v1362_v11  ;;  %v7122_v18 = vmax.f32 %v5903_v7, 0.0  ;;  %v1695_v36 = vmax.f32 %v1668_v42, %v1691_v27  ;;  %v1718_v14 = vmax.f32 %v6235_v46, 0.0  ;;  %v1835_v46 = vld [vmem:[%s6950_s7 + $0x20] sm:$0xff] }
 0x163   : > { %4808 = vmatprep.subr.bf16.mxu0 %v6227_v15  ;;  %v7124_v29 = vmax.f32 %v7123_v49, 0.0  ;;  %v1796_v4 = vmax.f32 %v6241_v20, 0.0  ;;  %v1815_v3 = vsel %vm6161_vm5, %v1804_v1, 0.0  ;;  %v1805_v11 = vadd.f32 %v5481_v58, %v6145_v50  ;;  %4513 = vmatmul.mubr.msk.f32.gmra.mrb[58].mxu0 %vm1887_vm3, %v5915_v17 }
 0x164   : > { %v1748_v41 = vmax.f32 %v1721_v59, %v7122_v18  ;;  %v1789_v43 = vsel %vm6117_vm4, %v1778_v55, 0.0  ;;  %v1722_v42 = vmax.f32 %v1695_v36, %v1718_v14  ;;  %v6264_v51 = vadd.f32 %v1815_v3, %v5449_v47  ;;  %4543 = vmatprep.mubr.msk.f32.mxu0 %vm1887_vm3, %v5360_v9 }
 0x165   : > { %v1774_v48 = vmax.f32 %v1747_v39, %v7124_v29  ;;  %v1793_v39 = vadd.f32 %v1789_v43, %v5521_v25  ;;  %v7125_v38 = vmax.f32 %v5926_v60, 0.0  ;;  %v1800_v20 = vmax.f32 %v1773_v22, %v1796_v4 }
 0x166   : > { %v1816_v1 = vsel %vm6161_vm5, %v1805_v11, 0.0  ;;  %v1779_v58 = vadd.f32 %v1368_v63, %v5549_v33  ;;  %v1806_v47 = vadd.f32 %v1370_v21, %v5549_v33  ;;  %v7126_v50 = vmax.f32 %v5948_v24, 0.0 }
 0x167   : > { %v1775_v59 = vmax.f32 %v1748_v41, %v7125_v38  ;;  %v1823_v18 = vmax.f32 %v6264_v51, 0.0  ;;  %v1797_v36 = vmax.f32 %v1793_v39, 0.0  ;;  %v1820_v29 = vadd.f32 %v1816_v1, %v5521_v25  ;;  %4544 = vmatmul.mubr.msk.f32.vlgmr.msra.gmra.mrb[60].mxu0 %vm1887_vm3, %v5753_v54 }
 0x168   : > { %v1749_v55 = vmax.f32 %v1722_v42, %v7126_v50  ;;  %v1790_v22 = vsel %vm6117_vm4, %v1779_v58, 0.0  ;;  %v1817_v41 = vsel %vm6161_vm5, %v1806_v47, 0.0  ;;  %v1780_v3 = vadd.f32 %v5537_v12, %v1374_v34  ;;  %v7131_v50 = vld [vmem:[#allocation8_spill] sm:$0xff]  ;;  %4810 = vmatpush3.bf16.msra.mxu0 %v6227_v15  ;;  %4546 = vmatprep.mubr.msk.f32.mxu0 %vm1887_vm3, %v5775_v37 }
 0x169   : > { %v7127_v63 = vmax.f32 %v7090_v52, 0.0  ;;  %v7128_v33 = vmax.f32 %v7106_v32, 0.0  ;;  %v1801_v43 = vmax.f32 %v1774_v48, %v1797_v36  ;;  %v1824_v11 = vmax.f32 %v1820_v29, 0.0 }
 0x16a   : > { %v1794_v25 = vadd.f32 %v1790_v22, %v5564_v2  ;;  %v1821_v42 = vadd.f32 %v1817_v41, %v5564_v2  ;;  %v1776_v34 = vmax.f32 %v1749_v55, %v1772_v35  ;;  %v1791_v52 = vsel %vm6117_vm4, %v1780_v3, 0.0  ;;  %v7133_v55 = vld [vmem:[#allocation9_spill] sm:$0xff] }
 0x16b   : > { %v4811_v21 = vpack.c.bf16 %v7128_v33, %v7127_v63  ;;  %v1807_v32 = vadd.f32 %v5537_v12, %v1376_v8  ;;  %v7129_v48 = vmax.f32 %v6096_v56, 0.0  ;;  %v7130_v51 = vmax.f32 %v6152_v0, 0.0  ;;  %v7136_v41 = vld [vmem:[#allocation17_spill] sm:$0xff]  ;;  %4547 = vmatmul.mubr.msk.f32.gmra.mrb[62].mxu0 %vm1887_vm3, %v5811_v31 }
 0x16c   : > { %v1798_v38 = vmax.f32 %v1794_v25, 0.0  ;;  %v1825_v1 = vmax.f32 %v1821_v42, 0.0  ;;  %v1795_v2 = vadd.f32 %v1791_v52, %v5633_v28  ;;  %v1827_v58 = vmax.f32 %v1800_v20, %v1823_v18  ;;  %v7138_v3 = vld [vmem:[#allocation21_spill] sm:$0xff]  ;;  %v7142_v25 = vld [vmem:[#allocation12_spill] sm:$0xff]  ;;  %4549 = vmatprep.mubr.msk.f32.mxu0 %vm1887_vm3, %v5831_v26 }
 0x16d   : > { %v6305_v39 = vpack.c.bf16 %v7130_v51, %v7129_v48  ;;  %v1818_v9 = vsel %vm6161_vm5, %v1807_v32, 0.0  ;;  %v1828_v47 = vmax.f32 %v1801_v43, %v1824_v11  ;;  %v7132_v23 = vmax.f32 %v7131_v50, 0.0  ;;  %4812 = vmatprep.subr.bf16.mxu0 %v4811_v21 }
 0x16e   : > { %v7134_v29 = vmax.f32 %v7133_v55, 0.0  ;;  %v7135_v8 = vmax.f32 %v6179_v53, 0.0  ;;  %v1802_v0 = vmax.f32 %v1775_v59, %v1798_v38  ;;  %v1799_v22 = vmax.f32 %v1795_v2, 0.0  ;;  %4814 = vmatpush3.bf16.msra.mxu0 %v4811_v21 }
 0x16f   : > { %v1822_v20 = vadd.f32 %v1818_v9, %v5633_v28  ;;  %v7137_v30 = vmax.f32 %v7136_v41, 0.0  ;;  %v7139_v63 = vmax.f32 %v7138_v3, 0.0  ;;  %v4735_v53 = vpack.c.bf16 %v1828_v47, %v1827_v58  ;;  %v7144_v28 = vld [vmem:[#allocation14_spill] sm:$0xff]  ;;  %v7150_v47 = vld [vmem:[#allocation23_spill] sm:$0xff]  ;;  %4824 = vmatprep.subr.bf16.mxu0 %v6305_v39  ;;  %4550 = vmatmul.mubr.msk.f32.gmra.mrb[64].mxu0 %vm1887_vm3, %v5860_v61 }
 0x170   : > { %v4751_v12 = vpack.c.bf16 %v7134_v29, %v7132_v23  ;;  %v6316_v56 = vpack.c.bf16 %v1691_v27, %v7135_v8  ;;  %v7140_v27 = vmax.f32 %v7112_v16, 0.0  ;;  %v7141_v59 = vmax.f32 %v7119_v13, 0.0  ;;  %v7148_v16 = vld [vmem:[#allocation18_spill] sm:$0xff]  ;;  %v7152_v29 = vld [vmem:[#allocation25_spill] sm:$0xff]  ;;  %4552 = vmatprep.mubr.msk.f32.mxu0 %vm1887_vm3, %v7094_v40 }
 0x171   : > { %v4755_v33 = vpack.c.bf16 %v7139_v63, %v7137_v30  ;;  %v7143_v42 = vmax.f32 %v7142_v25, 0.0  ;;  %v7145_v52 = vmax.f32 %v7144_v28, 0.0  ;;  %v1803_v48 = vmax.f32 %v1776_v34, %v1799_v22  ;;  %4736 = vmatprep.subr.bf16.mxu1 %v4735_v53  ;;  %v7162_v63 = vld [vmem:[#allocation29_spill] sm:$0xff] }
 0x172   : > { %v6332_v43 = vpack.c.bf16 %v7141_v59, %v7140_v27  ;;  %v1826_v51 = vmax.f32 %v1822_v20, 0.0  ;;  %v1829_v15 = vmax.f32 %v1802_v0, %v1825_v1  ;;  %v7146_v2 = vmax.f32 %v5903_v7, 0.0  ;;  %4738 = vmatpush3.bf16.msra.mxu1 %v4735_v53  ;;  %v7166_v59 = vld [vmem:[#allocation10_spill] sm:$0xff] }
 0x173   : > { %v6338_v32 = vpack.c.bf16 %v7145_v52, %v7143_v42  ;;  %v7147_v58 = vmax.f32 %v5948_v24, 0.0  ;;  %v7149_v13 = vmax.f32 %v7148_v16, 0.0  ;;  %v7151_v50 = vmax.f32 %v7150_v47, 0.0  ;;  %v7173_v16 = vld [vmem:[#allocation26_spill] sm:$0xff]  ;;  %4553 = vmatmul.mubr.msk.f32.gmra.mrb[66].mxu0 %vm1887_vm3, %v5915_v17 }
 0x174   : > { %v6352_v55 = vpack.c.bf16 %v1797_v36, %v1796_v4  ;;  %v7153_v34 = vmax.f32 %v7152_v29, 0.0  ;;  %v7154_v8 = vmax.f32 %v5907_v44, 0.0  ;;  %v6360_v7 = vpack.c.bf16 %v1799_v22, %v1798_v38  ;;  %v7158_v36 = vld [vmem:[#allocation27_spill] sm:$0xff]  ;;  %v7160_v38 = vld [vmem:[#allocation28_spill] sm:$0xff] }
 0x175   : > { %v6344_v9 = vpack.c.bf16 %v7147_v58, %v7146_v2  ;;  %v6350_v23 = vpack.c.bf16 %v7151_v50, %v7149_v13  ;;  %v1830_v24 = vmax.f32 %v1803_v48, %v1826_v51  ;;  %v7155_v20 = vmax.f32 %v5995_v57, 0.0  ;;  %v7164_v57 = vld [vmem:[#allocation7_spill] sm:$0xff] }
 0x176   : > { %v6358_v0 = vpack.c.bf16 %v7154_v8, %v7153_v34  ;;  %v7156_v41 = vmax.f32 %v6057_v6, 0.0  ;;  %v7157_v4 = vmax.f32 %v5896_v5, 0.0  ;;  %v7159_v3 = vmax.f32 %v7158_v36, 0.0  ;;  %v7168_v5 = vld [vmem:[#allocation13_spill] sm:$0xff]  ;;  %v7171_v2 = vld [vmem:[#allocation11_spill] sm:$0xff] }
 0x177   : > { %v7161_v22 = vmax.f32 %v7160_v38, 0.0  ;;  %v7163_v53 = vmax.f32 %v7162_v63, 0.0  ;;  %v7165_v6 = vmax.f32 %v7164_v57, 0.0  ;;  %v7167_v25 = vmax.f32 %v7166_v59, 0.0 }
 0x178   : > { %v6368_v30 = vpack.c.bf16 %v7156_v41, %v7155_v20  ;;  %v6374_v44 = vpack.c.bf16 %v7159_v3, %v7157_v4  ;;  %v7169_v28 = vmax.f32 %v7168_v5, 0.0  ;;  %v7170_v52 = vmax.f32 %v7110_v10, 0.0 }
 0x179   : > { %v6382_v27 = vpack.c.bf16 %v7163_v53, %v7161_v22  ;;  %v6388_v42 = vpack.c.bf16 %v7167_v25, %v7165_v6  ;;  %v4739_v48 = vpack.c.bf16 %v1830_v24, %v1829_v15  ;;  %v7172_v58 = vmax.f32 %v7171_v2, 0.0 }
 0x17a   : > { %v6394_v21 = vpack.c.bf16 %v7170_v52, %v7169_v28  ;;  %v7174_v13 = vmax.f32 %v7173_v16, 0.0  ;;  %v7175_v50 = vmax.f32 %v6194_v19, 0.0  ;;  %v7176_v34 = vmax.f32 %v7115_v45, 0.0  ;;  %v6441_v19 = vld [vmem:[%s6949_s6] sm:$0xff]  ;;  %v1834_v45 = vld [vmem:[%s6950_s7 + $0x18] sm:$0xff] }
 0x17b   : > { %v7177_v10 = vmax.f32 %v7123_v49, 0.0  ;;  %v7178_v15 = vmax.f32 %v5926_v60, 0.0  ;;  %v6421_v20 = vpack.c.bf16 %v1824_v11, %v1823_v18  ;;  %v6423_v41 = vpack.c.bf16 %v1826_v51, %v1825_v1  ;;  %4740 = vmatprep.subr.bf16.mxu1 %v4739_v48  ;;  %v1832_v60 = vld [vmem:[%s6950_s7 + $0x8] sm:$0xff]  ;;  %4583 = vmatprep.mubr.msk.f32.mxu0 %vm1887_vm3, %v6441_v19  ;;  %v1838_v49 = vld [vmem:[%s6950_s7 + $0x38] sm:$0xff] }
 0x17c   : > { %v6401_v47 = vpack.c.bf16 %v7174_v13, %v7172_v58  ;;  %v6407_v29 = vpack.c.bf16 %v1718_v14, %v7175_v50  ;;  %4742 = vmatpush3.bf16.msra.mxu1 %v4739_v48  ;;  %4584 = vmatmul.mubr.msk.f32.vlgmr.msra.gmra.mrb[68].mxu0 %vm1887_vm3, %v5753_v54  ;;  %v1837_v14 = vld [vmem:[%s6950_s7 + $0x30] sm:$0xff] }
 0x17d   : > { %v6413_v8 = vpack.c.bf16 %v7177_v10, %v7176_v34  ;;  %v6419_v24 = vpack.c.bf16 %v1772_v35, %v7178_v15  ;;  %4752 = vmatprep.subr.bf16.mxu1 %v4751_v12  ;;  %4826 = vmatpush3.bf16.msra.mxu0 %v6305_v39  ;;  %v1836_v35 = vld [vmem:[%s6950_s7 + $0x28] sm:$0xff] }
 0x17e   : > { %4586 = vmatprep.mubr.msk.f32.mxu0 %vm1887_vm3, %v5775_v37  ;;  %4828 = vmatprep.subr.bf16.mxu0 %v6316_v56 }
 0x17f   : > { %4404 = vmatmul.mubr.msk.f32.vlgmr.msra.gmra.mrb[32].mxu1 %vm1887_vm3, %v1832_v60 }
 0x180   : > { %4754 = vmatpush3.bf16.msra.mxu1 %v4751_v12  ;;  %4406 = vmatprep.mubr.msk.f32.mxu1 %vm1887_vm3, %v1833_v62 }
 0x181   : > { %4756 = vmatprep.subr.bf16.mxu1 %v4755_v33  ;;  %4587 = vmatmul.mubr.msk.f32.gmra.mrb[70].mxu0 %vm1887_vm3, %v5811_v31 }
 0x182   : > { %4830 = vmatpush3.bf16.msra.mxu0 %v6316_v56  ;;  %4589 = vmatprep.mubr.msk.f32.mxu0 %vm1887_vm3, %v5831_v26 }
 0x183   : > { %4407 = vmatmul.mubr.msk.f32.gmra.mrb[34].mxu1 %vm1887_vm3, %v1834_v45  ;;  %4840 = vmatprep.subr.bf16.mxu0 %v6332_v43 }
 0x184   : > { %4758 = vmatpush3.bf16.msra.mxu1 %v4755_v33  ;;  %4409 = vmatprep.mubr.msk.f32.mxu1 %vm1887_vm3, %v1835_v46 }
 0x185   : > { %4768 = vmatprep.subr.bf16.mxu1 %v6338_v32  ;;  %4590 = vmatmul.mubr.msk.f32.gmra.mrb[72].mxu0 %vm1887_vm3, %v5860_v61 }
 0x186   : > { %4592 = vmatprep.mubr.msk.f32.mxu0 %vm1887_vm3, %v7094_v40 }
 0x187   : > { %4410 = vmatmul.mubr.msk.f32.gmra.mrb[36].mxu1 %vm1887_vm3, %v1836_v35 }
 0x188   : > { %4412 = vmatprep.mubr.msk.f32.mxu1 %vm1887_vm3, %v1837_v14 }
 0x189   : > { %4593 = vmatmul.mubr.msk.f32.gmra.mrb[74].mxu0 %vm1887_vm3, %v5915_v17 }
 0x18a   : > { %4623 = vmatprep.mubr.msk.f32.mxu0 %vm1887_vm3, %v6441_v19 }
 0x18b   : > { %4413 = vmatmul.mubr.msk.f32.gmra.mrb[38].mxu1 %vm1887_vm3, %v1838_v49 }
 0x18c   : > { %4443 = vmatprep.mubr.msk.f32.mxu1 %vm1887_vm3, %v6441_v19 }
 0x18d   : > { %4624 = vmatmul.mubr.msk.f32.vlgmr.msra.gmra.mrb[76].mxu0 %vm1887_vm3, %v5753_v54 }
 0x18e   : > { %4842 = vmatpush3.bf16.msra.mxu0 %v6332_v43  ;;  %4626 = vmatprep.mubr.msk.f32.mxu0 %vm1887_vm3, %v5775_v37 }
 0x18f   : > { %4444 = vmatmul.mubr.msk.f32.vlgmr.msra.gmra.mrb[40].mxu1 %vm1887_vm3, %v5753_v54  ;;  %4844 = vmatprep.subr.bf16.mxu0 %v6344_v9 }
 0x190   : > { %4770 = vmatpush3.bf16.msra.mxu1 %v6338_v32  ;;  %4446 = vmatprep.mubr.msk.f32.mxu1 %vm1887_vm3, %v5775_v37 }
 0x191   : > { %4772 = vmatprep.subr.bf16.mxu1 %v6350_v23  ;;  %4627 = vmatmul.mubr.msk.f32.gmra.mrb[78].mxu0 %vm1887_vm3, %v5811_v31 }
 0x192   : > { %4846 = vmatpush3.bf16.msra.mxu0 %v6344_v9  ;;  %4629 = vmatprep.mubr.msk.f32.mxu0 %vm1887_vm3, %v5831_v26 }
 0x193   : > { %4447 = vmatmul.mubr.msk.f32.gmra.mrb[42].mxu1 %vm1887_vm3, %v5811_v31  ;;  %4856 = vmatprep.subr.bf16.mxu0 %v6352_v55 }
 0x194   : > { %4774 = vmatpush3.bf16.msra.mxu1 %v6350_v23  ;;  %4449 = vmatprep.mubr.msk.f32.mxu1 %vm1887_vm3, %v5831_v26 }
 0x195   : > { %4784 = vmatprep.subr.bf16.mxu1 %v6358_v0  ;;  %4630 = vmatmul.mubr.msk.f32.gmra.mrb[80].mxu0 %vm1887_vm3, %v5860_v61 }
 0x196   : > { %4632 = vmatprep.mubr.msk.f32.mxu0 %vm1887_vm3, %v7094_v40 }
 0x197   : > { %4450 = vmatmul.mubr.msk.f32.gmra.mrb[44].mxu1 %vm1887_vm3, %v5860_v61 }
 0x198   : > { %4452 = vmatprep.mubr.msk.f32.mxu1 %vm1887_vm3, %v7094_v40 }
 0x199   : > { %4633 = vmatmul.mubr.msk.f32.gmra.mrb[82].mxu0 %vm1887_vm3, %v5915_v17 }
 0x19a   : > { %4663 = vmatprep.mubr.msk.f32.mxu0 %vm1887_vm3, %v6441_v19 }
 0x19b   : > { %4453 = vmatmul.mubr.msk.f32.gmra.mrb[46].mxu1 %vm1887_vm3, %v5915_v17 }
 0x19c   : > { %4483 = vmatprep.mubr.msk.f32.mxu1 %vm1887_vm3, %v6441_v19 }
 0x19d   : > { %4664 = vmatmul.mubr.msk.f32.vlgmr.msra.gmra.mrb[84].mxu0 %vm1887_vm3, %v5753_v54 }
 0x19e   : > { %4858 = vmatpush3.bf16.msra.mxu0 %v6352_v55  ;;  %4666 = vmatprep.mubr.msk.f32.mxu0 %vm1887_vm3, %v5775_v37 }
 0x19f   : > { %4484 = vmatmul.mubr.msk.f32.vlgmr.msra.gmra.mrb[48].mxu1 %vm1887_vm3, %v5753_v54  ;;  %4860 = vmatprep.subr.bf16.mxu0 %v6360_v7 }
 0x1a0   : > { %4786 = vmatpush3.bf16.msra.mxu1 %v6358_v0  ;;  %4486 = vmatprep.mubr.msk.f32.mxu1 %vm1887_vm3, %v5775_v37 }
 0x1a1   : > { %4788 = vmatprep.subr.bf16.mxu1 %v6368_v30  ;;  %4667 = vmatmul.mubr.msk.f32.gmra.mrb[86].mxu0 %vm1887_vm3, %v5811_v31 }
 0x1a2   : > { %4862 = vmatpush3.bf16.msra.mxu0 %v6360_v7  ;;  %4669 = vmatprep.mubr.msk.f32.mxu0 %vm1887_vm3, %v5831_v26 }
 0x1a3   : > { %4487 = vmatmul.mubr.msk.f32.gmra.mrb[50].mxu1 %vm1887_vm3, %v5811_v31 }
 0x1a4   : > { %4790 = vmatpush3.bf16.msra.mxu1 %v6368_v30  ;;  %4489 = vmatprep.mubr.msk.f32.mxu1 %vm1887_vm3, %v5831_v26 }
 0x1a5   : > { %4800 = vmatprep.subr.bf16.mxu1 %v6374_v44  ;;  %4670 = vmatmul.mubr.msk.f32.gmra.mrb[88].mxu0 %vm1887_vm3, %v5860_v61 }
 0x1a6   : > { %4672 = vmatprep.mubr.msk.f32.mxu0 %vm1887_vm3, %v7094_v40 }
 0x1a7   : > { %4490 = vmatmul.mubr.msk.f32.gmra.mrb[52].mxu1 %vm1887_vm3, %v5860_v61 }
 0x1a8   : > { %4492 = vmatprep.mubr.msk.f32.mxu1 %vm1887_vm3, %v7094_v40 }
 0x1a9   : > { %4673 = vmatmul.mubr.msk.f32.gmra.mrb[90].mxu0 %vm1887_vm3, %v5915_v17 }
 0x1aa   : > { %4703 = vmatprep.mubr.msk.f32.mxu0 %vm1887_vm3, %v6441_v19 }
 0x1ab   : > { %4493 = vmatmul.mubr.msk.f32.gmra.mrb[54].mxu1 %vm1887_vm3, %v5915_v17 }
 0x1ac   : > { %4523 = vmatprep.mubr.msk.f32.mxu1 %vm1887_vm3, %v6441_v19 }
 0x1ad   : > { %4704 = vmatmul.mubr.msk.f32.vlgmr.msra.gmra.mrb[92].mxu0 %vm1887_vm3, %v5753_v54 }
 0x1ae   : > { %4706 = vmatprep.mubr.msk.f32.mxu0 %vm1887_vm3, %v5775_v37 }
 0x1af   : > { %4524 = vmatmul.mubr.msk.f32.vlgmr.msra.gmra.mrb[56].mxu1 %vm1887_vm3, %v5753_v54 }
 0x1b0   : > { %4802 = vmatpush3.bf16.msra.mxu1 %v6374_v44  ;;  %4526 = vmatprep.mubr.msk.f32.mxu1 %vm1887_vm3, %v5775_v37 }
 0x1b1   : > { %4804 = vmatprep.subr.bf16.mxu1 %v6382_v27  ;;  %4707 = vmatmul.mubr.msk.f32.gmra.mrb[94].mxu0 %vm1887_vm3, %v5811_v31 }
 0x1b2   : > { %4709 = vmatprep.mubr.msk.f32.mxu0 %vm1887_vm3, %v5831_v26 }
 0x1b3   : > { %4527 = vmatmul.mubr.msk.f32.gmra.mrb[58].mxu1 %vm1887_vm3, %v5811_v31 }
 0x1b4   : > { %4806 = vmatpush3.bf16.msra.mxu1 %v6382_v27  ;;  %4529 = vmatprep.mubr.msk.f32.mxu1 %vm1887_vm3, %v5831_v26 }
 0x1b5   : > { %4816 = vmatprep.subr.bf16.mxu1 %v6388_v42  ;;  %4710 = vmatmul.mubr.msk.f32.gmra.mrb[96].mxu0 %vm1887_vm3, %v5860_v61 }
 0x1b6   : > { %4712 = vmatprep.mubr.msk.f32.mxu0 %vm1887_vm3, %v7094_v40 }
 0x1b7   : > { %4530 = vmatmul.mubr.msk.f32.gmra.mrb[60].mxu1 %vm1887_vm3, %v5860_v61 }
 0x1b8   : > { %4532 = vmatprep.mubr.msk.f32.mxu1 %vm1887_vm3, %v7094_v40 }
 0x1b9   : > { %4713 = vmatmul.mubr.msk.f32.gmra.mrb[98].mxu0 %vm1887_vm3, %v5915_v17 }
 0x1bb   : > { %4533 = vmatmul.mubr.msk.f32.gmra.mrb[62].mxu1 %vm1887_vm3, %v5915_v17 }
 0x1bc   : > { %4563 = vmatprep.mubr.msk.f32.mxu1 %vm1887_vm3, %v6441_v19 }
 0x1bf   : > { %4564 = vmatmul.mubr.msk.f32.vlgmr.msra.gmra.mrb[64].mxu1 %vm1887_vm3, %v5753_v54 }
 0x1c0   : > { %4818 = vmatpush3.bf16.msra.mxu1 %v6388_v42  ;;  %4566 = vmatprep.mubr.msk.f32.mxu1 %vm1887_vm3, %v5775_v37 }
 0x1c1   : > { %4820 = vmatprep.subr.bf16.mxu1 %v6394_v21 }
 0x1c3   : > { %4567 = vmatmul.mubr.msk.f32.gmra.mrb[66].mxu1 %vm1887_vm3, %v5811_v31 }
 0x1c4   : > { %4822 = vmatpush3.bf16.msra.mxu1 %v6394_v21  ;;  %4569 = vmatprep.mubr.msk.f32.mxu1 %vm1887_vm3, %v5831_v26 }
 0x1c5   : > { %4832 = vmatprep.subr.bf16.mxu1 %v6401_v47 }
 0x1c7   : > { %4570 = vmatmul.mubr.msk.f32.gmra.mrb[68].mxu1 %vm1887_vm3, %v5860_v61 }
 0x1c8   : > { %4572 = vmatprep.mubr.msk.f32.mxu1 %vm1887_vm3, %v7094_v40 }
 0x1cb   : > { %4573 = vmatmul.mubr.msk.f32.gmra.mrb[70].mxu1 %vm1887_vm3, %v5915_v17 }
 0x1cc   : > { %4603 = vmatprep.mubr.msk.f32.mxu1 %vm1887_vm3, %v6441_v19 }
 0x1cf   : > { %4604 = vmatmul.mubr.msk.f32.vlgmr.msra.gmra.mrb[72].mxu1 %vm1887_vm3, %v5753_v54 }
 0x1d0   : > { %4834 = vmatpush3.bf16.msra.mxu1 %v6401_v47  ;;  %4606 = vmatprep.mubr.msk.f32.mxu1 %vm1887_vm3, %v5775_v37 }
 0x1d1   : > { %4836 = vmatprep.subr.bf16.mxu1 %v6407_v29 }
 0x1d3   : > { %4607 = vmatmul.mubr.msk.f32.gmra.mrb[74].mxu1 %vm1887_vm3, %v5811_v31 }
 0x1d4   : > { %4838 = vmatpush3.bf16.msra.mxu1 %v6407_v29  ;;  %4609 = vmatprep.mubr.msk.f32.mxu1 %vm1887_vm3, %v5831_v26 }
 0x1d5   : > { %4848 = vmatprep.subr.bf16.mxu1 %v6413_v8 }
 0x1d7   : > { %4610 = vmatmul.mubr.msk.f32.gmra.mrb[76].mxu1 %vm1887_vm3, %v5860_v61 }
 0x1d8   : > { %4612 = vmatprep.mubr.msk.f32.mxu1 %vm1887_vm3, %v7094_v40 }
 0x1db   : > { %4613 = vmatmul.mubr.msk.f32.gmra.mrb[78].mxu1 %vm1887_vm3, %v5915_v17 }
 0x1dc   : > { %4643 = vmatprep.mubr.msk.f32.mxu1 %vm1887_vm3, %v6441_v19 }
 0x1df   : > { %4644 = vmatmul.mubr.msk.f32.vlgmr.msra.gmra.mrb[80].mxu1 %vm1887_vm3, %v5753_v54 }
 0x1e0   : > { %4850 = vmatpush3.bf16.msra.mxu1 %v6413_v8  ;;  %4646 = vmatprep.mubr.msk.f32.mxu1 %vm1887_vm3, %v5775_v37 }
 0x1e1   : > { %4852 = vmatprep.subr.bf16.mxu1 %v6419_v24 }
 0x1e3   : > { %4647 = vmatmul.mubr.msk.f32.gmra.mrb[82].mxu1 %vm1887_vm3, %v5811_v31 }
 0x1e4   : > { %4854 = vmatpush3.bf16.msra.mxu1 %v6419_v24  ;;  %4649 = vmatprep.mubr.msk.f32.mxu1 %vm1887_vm3, %v5831_v26 }
 0x1e5   : > { %4864 = vmatprep.subr.bf16.mxu1 %v6421_v20 }
 0x1e7   : > { %4650 = vmatmul.mubr.msk.f32.gmra.mrb[84].mxu1 %vm1887_vm3, %v5860_v61 }
 0x1e8   : > { %4652 = vmatprep.mubr.msk.f32.mxu1 %vm1887_vm3, %v7094_v40 }
 0x1eb   : > { %4653 = vmatmul.mubr.msk.f32.gmra.mrb[86].mxu1 %vm1887_vm3, %v5915_v17 }
 0x1ec   : > { %4683 = vmatprep.mubr.msk.f32.mxu1 %vm1887_vm3, %v6441_v19 }
 0x1ef   : > { %4684 = vmatmul.mubr.msk.f32.vlgmr.msra.gmra.mrb[88].mxu1 %vm1887_vm3, %v5753_v54 }
 0x1f0   : > { %4866 = vmatpush3.bf16.msra.mxu1 %v6421_v20  ;;  %4686 = vmatprep.mubr.msk.f32.mxu1 %vm1887_vm3, %v5775_v37 }
 0x1f1   : > { %4868 = vmatprep.subr.bf16.mxu1 %v6423_v41 }
 0x1f3   : > { %4687 = vmatmul.mubr.msk.f32.gmra.mrb[90].mxu1 %vm1887_vm3, %v5811_v31 }
 0x1f4   : > { %4870 = vmatpush3.bf16.msra.mxu1 %v6423_v41  ;;  %4689 = vmatprep.mubr.msk.f32.mxu1 %vm1887_vm3, %v5831_v26 }
 0x1f7   : > { %4690 = vmatmul.mubr.msk.f32.gmra.mrb[92].mxu1 %vm1887_vm3, %v5860_v61 }
 0x1f8   : > { %4692 = vmatprep.mubr.msk.f32.mxu1 %vm1887_vm3, %v7094_v40 }
 0x1fb   : > { %4693 = vmatmul.mubr.msk.f32.gmra.mrb[94].mxu1 %vm1887_vm3, %v5915_v17 }
 0x1fc   : > { %4723 = vmatprep.mubr.msk.f32.mxu1 %vm1887_vm3, %v6441_v19 }
 0x1ff   : > { %4724 = vmatmul.mubr.msk.f32.vlgmr.msra.gmra.mrb[96].mxu1 %vm1887_vm3, %v5753_v54 }
 0x200   : > { %4726 = vmatprep.mubr.msk.f32.mxu1 %vm1887_vm3, %v5775_v37 }
 0x203   : > { %4727 = vmatmul.mubr.msk.f32.gmra.mrb[98].mxu1 %vm1887_vm3, %v5811_v31 }
 0x204   : > { %4729 = vmatprep.mubr.msk.f32.mxu1 %vm1887_vm3, %v5831_v26  ;;  %v4425_v18 = vpop.f32.mrb[36].mxu0 }
 0x205   : > { %v2115_v54 = vpop.f32.mrb[37].mxu0 }
 0x207   : > { %4730 = vmatmul.mubr.msk.f32.gmra.mrb[100].mxu1 %vm1887_vm3, %v5860_v61 }
 0x208   : > { %4732 = vmatprep.mubr.msk.f32.mxu1 %vm1887_vm3, %v7094_v40 }
 0x20a   : > { %v4428_v11 = vpop.f32.mrb[38].mxu0 }
 0x20b   : > { %4733 = vmatmul.mubr.msk.f32.gmra.mrb[102].mxu1 %vm1887_vm3, %v5915_v17  ;;  %v2125_v39 = vpop.f32.mrb[39].mxu0 }
 0x20e   : > { %v6695_v37 = vpop.f32.mrb[40].mxu0 }
 0x20f   : > { %v6697_v1 = vpop.f32.mrb[41].mxu0 }
 0x212   : > { %v6699_v31 = vpop.f32.mrb[42].mxu0 }
 0x213   : > { %v6701_v26 = vpop.f32.mrb[43].mxu0 }
 0x21a   : > { %v4465_v12 = vpop.f32.mrb[44].mxu0 }
 0x21b   : > { %v2333_v61 = vpop.f32.mrb[45].mxu0 }
 0x21e   : > { %v4468_v56 = vpop.f32.mrb[46].mxu0 }
 0x21f   : > { %v2343_v33 = vpop.f32.mrb[47].mxu0 }
 0x222   : > { %v4471_v40 = vpop.f32.mrb[48].mxu0 }
 0x223   : > { %v2353_v43 = vpop.f32.mrb[49].mxu0 }
 0x226   : > { %v4474_v32 = vpop.f32.mrb[50].mxu0 }
 0x227   : > { %v6703_v17 = vpop.f32.mrb[51].mxu0 }
 0x22a   : > { %v6705_v51 = vpop.f32.mrb[52].mxu0 }
 0x22b   : > { %v6707_v9 = vpop.f32.mrb[53].mxu0 }
 0x22e   : > { %v6709_v23 = vpop.f32.mrb[54].mxu0 }
 0x22f   : > { %v6711_v55 = vpop.f32.mrb[55].mxu0 }
 0x232   : > { %v6713_v0 = vpop.f32.mrb[56].mxu0 }
 0x233   : > { %v6715_v7 = vpop.f32.mrb[57].mxu0 }
 0x236   : > { %v6717_v30 = vpop.f32.mrb[58].mxu0 }
 0x237   : > { %v6719_v4 = vpop.f32.mrb[59].mxu0 }
 0x23a   : > { %v6721_v36 = vpop.f32.mrb[60].mxu0 }
 0x23b   : > { %v6723_v3 = vpop.f32.mrb[61].mxu0 }
 0x23e   : > { %v6725_v44 = vpop.f32.mrb[62].mxu0 }
 0x23f   : > { %v6727_v38 = vpop.f32.mrb[63].mxu0 }
 0x242   : > { %v6729_v22 = vpop.f32.mrb[64].mxu0 }
 0x243   : > { %v6731_v63 = vpop.f32.mrb[65].mxu0 }
 0x246   : > { %v6735_v27 = vpop.f32.mrb[66].mxu0 }
 0x247   : > { %v6739_v6 = vpop.f32.mrb[67].mxu0 }
 0x24f   : > { %v6743_v25 = vpop.f32.mrb[68].mxu0 }
 0x250   : > { %v6747_v5 = vpop.f32.mrb[69].mxu0 }
 0x252   : > { %v6733_v53 = vpop.f32.mrb[32].mxu1 }
 0x253   : > { %v6737_v57 = vpop.f32.mrb[33].mxu1 }
 0x254   : > { %v6751_v52 = vpop.f32.mrb[70].mxu0 }
 0x255   : > { %v6755_v48 = vpop.f32.mrb[71].mxu0 }
 0x256   : > { %v6741_v59 = vpop.f32.mrb[34].mxu1 }
 0x257   : > { %v6745_v42 = vpop.f32.mrb[35].mxu1 }
 0x258   : > { %v6759_v58 = vpop.f32.mrb[72].mxu0 }
 0x259   : > { %v6763_v13 = vpop.f32.mrb[73].mxu0 }
 0x25a   : > { %v6749_v28 = vpop.f32.mrb[36].mxu1 }
 0x25b   : > { %v6753_v21 = vpop.f32.mrb[37].mxu1 }
 0x25c   : > { %v6765_v50 = vpop.f32.mrb[74].mxu0 }
 0x25d   : > { %v6767_v10 = vpop.f32.mrb[75].mxu0 }
 0x25e   : > { %v6757_v2 = vpop.f32.mrb[38].mxu1 }
 0x25f   : > { %v6761_v16 = vpop.f32.mrb[39].mxu1 }
 0x260   : > { %7179 = vst [vmem:[#allocation6_spill] sm:$0xff] %v6761_v16  ;;  %v6769_v41 = vpop.f32.mrb[76].mxu0 }
 0x261   : > { %v6771_v19 = vpop.f32.mrb[77].mxu0 }
 0x262   : > { %v4445_v47 = vpop.f32.mrb[40].mxu1 }
 0x263   : > { %v2260_v29 = vmax.f32 %v4425_v18, %v4445_v47  ;;  %v2220_v34 = vpop.f32.mrb[41].mxu1 }
 0x264   : > { %v2259_v8 = vmax.f32 %v2115_v54, %v2220_v34  ;;  %v6773_v49 = vpop.f32.mrb[78].mxu0 }
 0x265   : > { %v2373_v15 = vmax.f32 %v2260_v29, %v4465_v12  ;;  %v6776_v16 = vpop.f32.mrb[79].mxu0 }
 0x266   : > { %v2372_v24 = vmax.f32 %v2259_v8, %v2333_v61  ;;  %v4448_v20 = vpop.f32.mrb[42].mxu1 }
 0x267   : > { %v2262_v60 = vmax.f32 %v4428_v11, %v4448_v20  ;;  %v2230_v62 = vpop.f32.mrb[43].mxu1 }
 0x268   : > { %v2261_v45 = vmax.f32 %v2125_v39, %v2230_v62  ;;  %v6779_v11 = vpop.f32.mrb[80].mxu0 }
 0x269   : > { %v2375_v46 = vmax.f32 %v2262_v60, %v4468_v56  ;;  %v6782_v56 = vpop.f32.mrb[81].mxu0 }
 0x26a   : > { %v2374_v35 = vmax.f32 %v2261_v45, %v2343_v33  ;;  %v4451_v14 = vpop.f32.mrb[44].mxu1 }
 0x26b   : > { %v2264_v18 = vmax.f32 %v6695_v37, %v4451_v14  ;;  %v2240_v47 = vpop.f32.mrb[45].mxu1 }
 0x26c   : > { %v2263_v54 = vmax.f32 %v6697_v1, %v2240_v47  ;;  %v6786_v60 = vpop.f32.mrb[82].mxu0 }
 0x26d   : > { %v2377_v12 = vmax.f32 %v2264_v18, %v4471_v40  ;;  %v6788_v40 = vpop.f32.mrb[83].mxu0 }
 0x26e   : > { %v4454_v61 = vpop.f32.mrb[46].mxu1  ;;  %v2376_v29 = vmax.f32 %v2263_v54, %v2353_v43 }
 0x26f   : > { %v2266_v34 = vmax.f32 %v6699_v31, %v4454_v61  ;;  %v2250_v39 = vpop.f32.mrb[47].mxu1 }
 0x270   : > { %v2265_v33 = vmax.f32 %v6701_v26, %v2250_v39  ;;  %v6792_v18 = vpop.f32.mrb[84].mxu0 }
 0x271   : > { %v2379_v8 = vmax.f32 %v2266_v34, %v4474_v32  ;;  %v6794_v32 = vpop.f32.mrb[85].mxu0 }
 0x272   : > { %v4485_v20 = vpop.f32.mrb[48].mxu1  ;;  %v2378_v37 = vmax.f32 %v2265_v33, %v6703_v17 }
 0x273   : > { %v2486_v62 = vmax.f32 %v2373_v15, %v4485_v20  ;;  %v2446_v1 = vpop.f32.mrb[49].mxu1 }
 0x274   : > { %v2485_v43 = vmax.f32 %v2372_v24, %v2446_v1  ;;  %v6798_v34 = vpop.f32.mrb[86].mxu0 }
 0x275   : > { %v2599_v45 = vmax.f32 %v2486_v62, %v6705_v51  ;;  %v6800_v51 = vpop.f32.mrb[87].mxu0 }
 0x276   : > { %v2598_v31 = vmax.f32 %v2485_v43, %v6707_v9  ;;  %v4488_v14 = vpop.f32.mrb[50].mxu1 }
 0x277   : > { %v2488_v47 = vmax.f32 %v2375_v46, %v4488_v14  ;;  %v2456_v26 = vpop.f32.mrb[51].mxu1 }
 0x278   : > { %v2487_v54 = vmax.f32 %v2374_v35, %v2456_v26  ;;  %v6804_v62 = vpop.f32.mrb[88].mxu0 }
 0x279   : > { %v2601_v17 = vmax.f32 %v2488_v47, %v6709_v23  ;;  %v6806_v23 = vpop.f32.mrb[89].mxu0 }
 0x27a   : > { %v2600_v15 = vmax.f32 %v2487_v54, %v6711_v55  ;;  %v4491_v61 = vpop.f32.mrb[52].mxu1 }
 0x27b   : > { %v2490_v24 = vmax.f32 %v2377_v12, %v4491_v61  ;;  %v2466_v39 = vpop.f32.mrb[53].mxu1 }
 0x27c   : > { %v2489_v9 = vmax.f32 %v2376_v29, %v2466_v39  ;;  %v6810_v47 = vpop.f32.mrb[90].mxu0 }
 0x27d   : > { %v2603_v33 = vmax.f32 %v2490_v24, %v6713_v0  ;;  %v6812_v0 = vpop.f32.mrb[91].mxu0 }
 0x27e   : > { %v2602_v46 = vmax.f32 %v2489_v9, %v6715_v7  ;;  %v4494_v20 = vpop.f32.mrb[54].mxu1 }
 0x27f   : > { %v2492_v35 = vmax.f32 %v2379_v8, %v4494_v20  ;;  %v2476_v1 = vpop.f32.mrb[55].mxu1 }
 0x280   : > { %v2491_v55 = vmax.f32 %v2378_v37, %v2476_v1  ;;  %v6816_v24 = vpop.f32.mrb[92].mxu0 }
 0x281   : > { %v2605_v43 = vmax.f32 %v2492_v35, %v6717_v30  ;;  %v6818_v30 = vpop.f32.mrb[93].mxu0 }
 0x282   : > { %v2604_v12 = vmax.f32 %v2491_v55, %v6719_v4  ;;  %v4525_v14 = vpop.f32.mrb[56].mxu1 }
 0x283   : > { %v2712_v29 = vmax.f32 %v2599_v45, %v4525_v14  ;;  %v2672_v26 = vpop.f32.mrb[57].mxu1 }
 0x284   : > { %v2711_v7 = vmax.f32 %v2598_v31, %v2672_v26  ;;  %v6822_v35 = vpop.f32.mrb[94].mxu0 }
 0x285   : > { %v2825_v54 = vmax.f32 %v2712_v29, %v6721_v36  ;;  %v6824_v36 = vpop.f32.mrb[95].mxu0 }
 0x286   : > { %v2824_v8 = vmax.f32 %v2711_v7, %v6723_v3  ;;  %v4528_v61 = vpop.f32.mrb[58].mxu1 }
 0x287   : > { %v2714_v37 = vmax.f32 %v2601_v17, %v4528_v61  ;;  %v2682_v39 = vpop.f32.mrb[59].mxu1 }
 0x288   : > { %v2713_v4 = vmax.f32 %v2600_v15, %v2682_v39  ;;  %v6828_v29 = vpop.f32.mrb[96].mxu0 }
 0x289   : > { %v2827_v9 = vmax.f32 %v2714_v37, %v6725_v44  ;;  %v6830_v44 = vpop.f32.mrb[97].mxu0 }
 0x28a   : > { %v2826_v45 = vmax.f32 %v2713_v4, %v6727_v38  ;;  %v4531_v20 = vpop.f32.mrb[60].mxu1 }
 0x28b   : > { %v2716_v31 = vmax.f32 %v2603_v33, %v4531_v20  ;;  %v2692_v1 = vpop.f32.mrb[61].mxu1 }
 0x28c   : > { %v2715_v3 = vmax.f32 %v2602_v46, %v2692_v1  ;;  %v6834_v37 = vpop.f32.mrb[98].mxu0 }
 0x28d   : > { %v2829_v55 = vmax.f32 %v2716_v31, %v6729_v22  ;;  %v6836_v22 = vpop.f32.mrb[99].mxu0 }
 0x28e   : > { %v2828_v17 = vmax.f32 %v2715_v3, %v6731_v63  ;;  %v4534_v14 = vpop.f32.mrb[62].mxu1 }
 0x28f   : > { %v2718_v15 = vmax.f32 %v2605_v43, %v4534_v14  ;;  %v2702_v26 = vpop.f32.mrb[63].mxu1 }
 0x290   : > { %v2717_v38 = vmax.f32 %v2604_v12, %v2702_v26 }
 0x291   : > { %v2831_v7 = vmax.f32 %v2718_v15, %v6735_v27 }
 0x292   : > { %v2830_v33 = vmax.f32 %v2717_v38, %v6739_v6  ;;  %v4565_v61 = vpop.f32.mrb[64].mxu1 }
 0x293   : > { %v2938_v46 = vmax.f32 %v2825_v54, %v4565_v61  ;;  %v2898_v39 = vpop.f32.mrb[65].mxu1 }
 0x294   : > { %v2937_v63 = vmax.f32 %v2824_v8, %v2898_v39 }
 0x295   : > { %v3051_v4 = vmax.f32 %v2938_v46, %v6743_v25 }
 0x296   : > { %v3050_v43 = vmax.f32 %v2937_v63, %v6747_v5  ;;  %v4568_v20 = vpop.f32.mrb[66].mxu1 }
 0x297   : > { %v2940_v31 = vmax.f32 %v2827_v9, %v4568_v20  ;;  %v2908_v1 = vpop.f32.mrb[67].mxu1 }
 0x298   : > { %v2939_v12 = vmax.f32 %v2826_v45, %v2908_v1 }
 0x299   : > { %v3053_v27 = vmax.f32 %v2940_v31, %v6751_v52 }
 0x29a   : > { %v3052_v6 = vmax.f32 %v2939_v12, %v6755_v48  ;;  %v4571_v3 = vpop.f32.mrb[68].mxu1 }
 0x29b   : > { %v2942_v14 = vmax.f32 %v2829_v55, %v4571_v3  ;;  %v2918_v15 = vpop.f32.mrb[69].mxu1 }
 0x29c   : > { %v2941_v54 = vmax.f32 %v2828_v17, %v2918_v15 }
 0x29d   : > { %v3055_v26 = vmax.f32 %v2942_v14, %v6759_v58 }
 0x29e   : > { %v3054_v8 = vmax.f32 %v2941_v54, %v6763_v13  ;;  %v4574_v38 = vpop.f32.mrb[70].mxu1 }
 0x29f   : > { %v2944_v25 = vmax.f32 %v2831_v7, %v4574_v38  ;;  %v2928_v61 = vpop.f32.mrb[71].mxu1 }
 0x2a0   : > { %v2943_v5 = vmax.f32 %v2830_v33, %v2928_v61 }
 0x2a1   : > { %v3057_v9 = vmax.f32 %v2944_v25, %v6765_v50 }
 0x2a2   : > { %v3056_v45 = vmax.f32 %v2943_v5, %v6767_v10  ;;  %v4605_v46 = vpop.f32.mrb[72].mxu1 }
 0x2a3   : > { %v3164_v52 = vmax.f32 %v3051_v4, %v4605_v46  ;;  %v3124_v39 = vpop.f32.mrb[73].mxu1 }
 0x2a4   : > { %v3163_v48 = vmax.f32 %v3050_v43, %v3124_v39 }
 0x2a5   : > { %v3277_v55 = vmax.f32 %v3164_v52, %v6769_v41 }
 0x2a6   : > { %v3276_v17 = vmax.f32 %v3163_v48, %v6771_v19  ;;  %v4608_v63 = vpop.f32.mrb[74].mxu1 }
 0x2a7   : > { %v3166_v58 = vmax.f32 %v3053_v27, %v4608_v63  ;;  %v3134_v20 = vpop.f32.mrb[75].mxu1 }
 0x2a8   : > { %v3165_v13 = vmax.f32 %v3052_v6, %v3134_v20 }
 0x2a9   : > { %v3279_v7 = vmax.f32 %v3166_v58, %v6773_v49 }
 0x2aa   : > { %v3278_v33 = vmax.f32 %v3165_v13, %v6776_v16  ;;  %v4611_v31 = vpop.f32.mrb[76].mxu1 }
 0x2ab   : > { %v3168_v50 = vmax.f32 %v3055_v26, %v4611_v31  ;;  %v3144_v1 = vpop.f32.mrb[77].mxu1 }
 0x2ac   : > { %v3167_v10 = vmax.f32 %v3054_v8, %v3144_v1  ;;  %v1855_v1 = vpop.permute.xlu1 %1854 }
 0x2ad   : > { %v3281_v4 = vmax.f32 %v3168_v50, %v6779_v11 }
 0x2ae   : > { %v3280_v43 = vmax.f32 %v3167_v10, %v6782_v56  ;;  %v4614_v12 = vpop.f32.mrb[78].mxu1 }
 0x2af   : > { %v3170_v41 = vmax.f32 %v3057_v9, %v4614_v12  ;;  %v3154_v3 = vpop.f32.mrb[79].mxu1 }
 0x2b0   : > { %v3169_v19 = vmax.f32 %v3056_v45, %v3154_v3 }
 0x2b1   : > { %v3283_v27 = vmax.f32 %v3170_v41, %v6786_v60 }
 0x2b2   : > { %v3282_v6 = vmax.f32 %v3169_v19, %v6788_v40  ;;  %v4645_v14 = vpop.f32.mrb[80].mxu1  ;;  %v1865_v19 = vpop.permute.xlu1 %1864 }
 0x2b3   : > { %v3390_v49 = vmax.f32 %v3277_v55, %v4645_v14  ;;  %v3350_v15 = vpop.f32.mrb[81].mxu1  ;;  %v1984_v14 = vadd.f32 %v6733_v53, %v1855_v1 }
 0x2b4   : > { %v3389_v16 = vmax.f32 %v3276_v17, %v3350_v15 }
 0x2b5   : > { %v3503_v54 = vmax.f32 %v3390_v49, %v6792_v18 }
 0x2b6   : > { %v3502_v26 = vmax.f32 %v3389_v16, %v6794_v32  ;;  %v4648_v8 = vpop.f32.mrb[82].mxu1 }
 0x2b7   : > { %v3392_v11 = vmax.f32 %v3279_v7, %v4648_v8  ;;  %v3360_v38 = vpop.f32.mrb[83].mxu1  ;;  %v1994_v8 = vadd.f32 %v6741_v59, %v1865_v19 }
 0x2b8   : > { %v3391_v56 = vmax.f32 %v3278_v33, %v3360_v38 }
 0x2b9   : > { %v3505_v25 = vmax.f32 %v3392_v11, %v6798_v34 }
 0x2ba   : > { %v3504_v61 = vmax.f32 %v3391_v56, %v6800_v51  ;;  %v4651_v5 = vpop.f32.mrb[84].mxu1 }
 0x2bb   : > { %v3394_v60 = vmax.f32 %v3281_v4, %v4651_v5  ;;  %v3370_v9 = vpop.f32.mrb[85].mxu1  ;;  %v1850_v4 = vpop.permute.xlu0 %1849 }
 0x2bc   : > { %v3393_v40 = vmax.f32 %v3280_v43, %v3370_v9 }
 0x2bd   : > { %v3507_v45 = vmax.f32 %v3394_v60, %v6804_v62 }
 0x2be   : > { %v3506_v46 = vmax.f32 %v3393_v40, %v6806_v23  ;;  %v4654_v52 = vpop.f32.mrb[86].mxu1 }
 0x2bf   : > { %v3396_v18 = vmax.f32 %v3283_v27, %v4654_v52  ;;  %v3380_v39 = vpop.f32.mrb[87].mxu1 }
 0x2c0   : > { %v3395_v32 = vmax.f32 %v3282_v6, %v3380_v39  ;;  %v1860_v6 = vpop.permute.xlu0 %1859 }
 0x2c1   : > { %v3509_v48 = vmax.f32 %v3396_v18, %v6810_v47  ;;  %v1989_v56 = vadd.f32 %v6745_v42, %v1860_v6 }
 0x2c2   : > { %v3508_v55 = vmax.f32 %v3395_v32, %v6812_v0  ;;  %v4685_v17 = vpop.f32.mrb[88].mxu1 }
 0x2c3   : > { %v3616_v34 = vmax.f32 %v3503_v54, %v4685_v17  ;;  %v3576_v63 = vpop.f32.mrb[89].mxu1 }
 0x2c4   : > { %v3615_v51 = vmax.f32 %v3502_v26, %v3576_v63  ;;  %v7180_v63 = vld [vmem:[#allocation6_spill] sm:$0xff] }
 0x2c5   : > { %v3729_v58 = vmax.f32 %v3616_v34, %v6816_v24 }
 0x2c6   : > { %v3728_v20 = vmax.f32 %v3615_v51, %v6818_v30  ;;  %v4688_v13 = vpop.f32.mrb[90].mxu1 }
 0x2c7   : > { %v3618_v62 = vmax.f32 %v3505_v25, %v4688_v13  ;;  %v3586_v7 = vpop.f32.mrb[91].mxu1 }
 0x2c8   : > { %v3617_v23 = vmax.f32 %v3504_v61, %v3586_v7  ;;  %v1870_v61 = vpop.permute.xlu0 %1869 }
 0x2c9   : > { %v3731_v33 = vmax.f32 %v3618_v62, %v6822_v35 }
 0x2ca   : > { %v3730_v31 = vmax.f32 %v3617_v23, %v6824_v36  ;;  %v4691_v47 = vpop.f32.mrb[92].mxu1 }
 0x2cb   : > { %v3620_v50 = vmax.f32 %v3507_v45, %v4691_v47  ;;  %v3596_v0 = vpop.f32.mrb[93].mxu1  ;;  %v1999_v45 = vadd.f32 %v6753_v21, %v1870_v61 }
 0x2cc   : > { %v3619_v10 = vmax.f32 %v3506_v46, %v3596_v0 }
 0x2cd   : > { %v3733_v24 = vmax.f32 %v3620_v50, %v6828_v29 }
 0x2ce   : > { %v3732_v30 = vmax.f32 %v3619_v10, %v6830_v44  ;;  %v4694_v43 = vpop.f32.mrb[94].mxu1  ;;  %v1979_v44 = vadd.f32 %v6737_v57, %v1850_v4 }
 0x2cf   : > { %v3622_v12 = vmax.f32 %v3509_v48, %v4694_v43  ;;  %v3606_v41 = vpop.f32.mrb[95].mxu1 }
 0x2d0   : > { %v3621_v3 = vmax.f32 %v3508_v55, %v3606_v41  ;;  %v1880_v55 = vpop.permute.xlu0 %1879 }
 0x2d1   : > { %v3735_v35 = vmax.f32 %v3622_v12, %v6834_v37  ;;  %v2009_v51 = vadd.f32 %v7180_v63, %v1880_v55 }
 0x2d2   : > { %v3734_v36 = vmax.f32 %v3621_v3, %v6836_v22  ;;  %v4725_v27 = vpop.f32.mrb[96].mxu1  ;;  %v1875_v22 = vpop.permute.xlu1 %1874 }
 0x2d3   : > { %v3842_v49 = vmax.f32 %v3729_v58, %v4725_v27  ;;  %v3802_v29 = vpop.f32.mrb[97].mxu1  ;;  %v2004_v60 = vadd.f32 %v6749_v28, %v1875_v22 }
 0x2d4   : > { %v3841_v15 = vmax.f32 %v3728_v20, %v3802_v29 }
 0x2d5   : > { %v3850_v16 = vadd.f32 %v3842_v49, %v1984_v14 }
 0x2d6   : > { %v3849_v54 = vadd.f32 %v3841_v15, %v1979_v44  ;;  %v4728_v26 = vpop.f32.mrb[98].mxu1  ;;  %v1885_v39 = vpop.permute.xlu1 %1884 }
 0x2d7   : > { %v3858_v37 = vmax.f32 %v3850_v16, 0.0  ;;  %v3844_v11 = vmax.f32 %v3731_v33, %v4728_v26  ;;  %v3812_v38 = vpop.f32.mrb[99].mxu1  ;;  %v2014_v17 = vadd.f32 %v6757_v2, %v1885_v39 }
 0x2d8   : > { %v3857_v25 = vmax.f32 %v3849_v54, 0.0  ;;  %v3843_v53 = vmax.f32 %v3730_v31, %v3812_v38 }
 0x2d9   : > { %3866 = vst [vmem:[%s6877_s27 + $0x8] sm:$0xff] %v3858_v37  ;;  %v3852_v57 = vadd.f32 %v3844_v11, %v1994_v8 }
 0x2da   : > { %3865 = vst [vmem:[%s6877_s27] sm:$0xff] %v3857_v25  ;;  %v3851_v5 = vadd.f32 %v3843_v53, %v1989_v56  ;;  %v4731_v59 = vpop.f32.mrb[100].mxu1 }
 0x2db   : > { %v3860_v9 = vmax.f32 %v3852_v57, 0.0  ;;  %v3846_v40 = vmax.f32 %v3733_v24, %v4731_v59  ;;  %v3822_v42 = vpop.f32.mrb[101].mxu1 }
 0x2dc   : > { %v3859_v46 = vmax.f32 %v3851_v5, 0.0  ;;  %v3845_v52 = vmax.f32 %v3732_v30, %v3822_v42 }
 0x2dd   : > { %3868 = vst [vmem:[%s6877_s27 + $0x18] sm:$0xff] %v3860_v9  ;;  %v3854_v18 = vadd.f32 %v3846_v40, %v2004_v60 }
 0x2de   : > { %3867 = vst [vmem:[%s6877_s27 + $0x10] sm:$0xff] %v3859_v46  ;;  %v3853_v32 = vadd.f32 %v3845_v52, %v1999_v45  ;;  %v4734_v48 = vpop.f32.mrb[102].mxu1 }
 0x2df   : > { %v3862_v28 = vmax.f32 %v3854_v18, 0.0  ;;  %v3848_v34 = vmax.f32 %v3735_v35, %v4734_v48  ;;  %v3832_v21 = vpop.f32.mrb[103].mxu1 }
 0x2e0   : > { %v3861_v58 = vmax.f32 %v3853_v32, 0.0  ;;  %v3847_v20 = vmax.f32 %v3734_v36, %v3832_v21 }
 0x2e1   : > { %3870 = vst [vmem:[%s6877_s27 + $0x28] sm:$0xff] %v3862_v28  ;;  %v3856_v13 = vadd.f32 %v3848_v34, %v2014_v17 }
 0x2e2   : > { %3869 = vst [vmem:[%s6877_s27 + $0x20] sm:$0xff] %v3861_v58  ;;  %v3855_v2 = vadd.f32 %v3847_v20, %v2009_v51 }
 0x2e3   : > { %v3864_v62 = vmax.f32 %v3856_v13, 0.0 }
 0x2e4   : > { %v3863_v7 = vmax.f32 %v3855_v2, 0.0 }
 0x2e5   : > { %3872 = vst [vmem:[%s6877_s27 + $0x38] sm:$0xff] %v3864_v62 }
 0x2e6   : > { %3871 = vst [vmem:[%s6877_s27 + $0x30] sm:$0xff] %v3863_v7 }
 0x2e7   : > { %4943 = shalt.err (!%p4940_p4)
}
 0x2e8   : > { %s4944_s17 = scalar_lea.hbm %s6896_s14, 1024  ;;  %s4948_s27 = scalar_lea.hbm %s6952_s9, 2048 }
 0x2e9   : > { %p4945_p7 = scmp.ne.s32.totalorder %s6896_s14, %s4944_s17  ;;  %p4949_p10 = scmp.lt.u32.totalorder %s6896_s14, %s6952_s9 }
 0x2ea   : > { %p4950_p11 = scmp.lt.u32.totalorder %s4948_s27, %s4944_s17  ;;  %p4952_p13 = scmp.lt.u32.totalorder %s4944_s17, %s6896_s14 }
 0x2eb   : > { %p4946_p8 = pnand %p4945_p7, %p5088_p5 }
 0x2ec   : > { %p4951_p12 = por %p4950_p11, %p4949_p10 }
 0x2ed   : > { %p4947_p9 = pneg %p4946_p8 }
 0x2ee   : > { %p4953_p0 = por %p4952_p13, %p4951_p12 }
 0x2f0   : > { %p4954_p1 = pnand %p4953_p0, %p4947_p9 }
 0x2f2   : > { %4957 = shalt.err (!%p4954_p1)
}
 0x2f3   : > { %s4997_s29 = smov 128   ;;  %s4998_s16 = smov 256  }
 0x2f4   : > { %s4999_s22 = smov 8  }
 0x2f5   : > { %4875 = dma.vmem_to_hbm [thread:$0]  (%p5088_p5), %s6890_s24, 1024, %s6896_s14, %s6902_s13, %s4997_s29, %s4998_s16, %s4999_s22  }
 0x2f6 PF: > { %p4881_p2 = scmp.ge.s32.totalorder %s4992_s12, 2  ;;  %s3901_s23 = sand.u32 1, %s4980_s30  }
 0x2f7   : > { %s3902_s21 = scalar_lea.sflag [#allocation3], %s3901_s23 }
 0x2f8   : > { %p4878_p3 = pnand %p4881_p2, %p5092_p6 }
 0x2fa   : > { %4975 = dma.done.wait (!%p4878_p3), %s3902_s21, 1024  }
 0x2fb   : > { %4977 = vsyncadd (!%p4878_p3), %s3902_s21, 4294966272  ;;  %s7181_s17 = sld [smem:[#allocation5_spill]]  ;;  %p19_p4 = scmp.ge.s32.totalorder %s5075_s15, 4  }
 0x2fc   : > { %s7182_s30 = smov %s4984_s10  ;;  %s7183_s10 = smov %s4988_s11 }
 0x2fd   : > { %s7185_s12 = smov %s5075_s15  ;;  %21 = sbr.rel (!%p19_p4) target bundleno = 3 (0x3), region = 94 }
 0x301   : > { %s7184_s11 = smov %s7181_s17 }
 0x304   :  { %3907 = vsyncpa [#allocation3], 1 }
 0x305   :  { %3909 = vsyncpa [#allocation3 + $0x1], 1 }

</bundles_post_ra>
